<compile_context>
chip_gen: v5e
topology: v5e:2x2
jax: 0.10.0
libtpu: 0.0.40
codegen_flags: <defaults>
</compile_context>

<pallas_src>
import jax
import jax.numpy as jnp
from jax.experimental import pallas as pl
from jax.experimental.pallas import tpu as pltpu

IN_DIM = 3920
IN_PAD = 3968          # 31 * 128: lane-aligned feature dim
HID = 128
NUM_CLASSES = 6
OUT_PAD = 128          # fc4 output padded to a full lane width; sliced outside


def _round_up(n, m):
    return (n + m - 1) // m * m


def mlp_kernel(x_ref, w1_ref, b1_ref, w2_ref, b2_ref, w3_ref, b3_ref,
               w4_ref, b4_ref, o_ref):
    # fc1 (bf16 inputs, f32 accumulate) + bias + relu
    h = jnp.dot(x_ref[...], w1_ref[...], preferred_element_type=jnp.float32)
    h = jnp.maximum(h + b1_ref[...], 0.0)
    # (dropout = identity at inference)
    # fc2 + relu
    h = jnp.dot(h, w2_ref[...], preferred_element_type=jnp.float32)
    h = jnp.maximum(h + b2_ref[...], 0.0)
    # fc3 + relu
    h = jnp.dot(h, w3_ref[...], preferred_element_type=jnp.float32)
    h = jnp.maximum(h + b3_ref[...], 0.0)
    # fc4 (no activation); padded output columns carry zeros
    out = jnp.dot(h, w4_ref[...], preferred_element_type=jnp.float32)
    o_ref[...] = (out + b4_ref[...]).astype(o_ref.dtype)


def prepare_params(params):
    """One-time parameter prep (hoisted out of the per-call path):
       - pad fc1 rows IN_DIM -> IN_PAD and cast to bf16 (dominant HBM traffic)
       - pad fc4 cols NUM_CLASSES -> OUT_PAD for a lane-dense output slab
       - reshape biases to (1, out) rows for broadcasting."""
    w1, b1, w2, b2, w3, b3, w4, b4 = params
    w1p = jnp.zeros((IN_PAD, HID), jnp.float32).at[:IN_DIM, :].set(w1)
    w1p = w1p.astype(jnp.bfloat16)
    w4p = jnp.zeros((HID, OUT_PAD), jnp.float32).at[:, :NUM_CLASSES].set(w4)
    b4p = jnp.zeros((1, OUT_PAD), jnp.float32).at[:, :NUM_CLASSES].set(b4)
    return (w1p, b1.reshape(1, HID),
            w2, b2.reshape(1, HID),
            w3, b3.reshape(1, HID),
            w4p, b4p)


def mlp_forward(x, prepared):
    """x: [B, 3920] float32 -> logits [B, NUM_CLASSES]."""
    B = x.shape[0]
    # Batch tile: 256 rows at large B (MXU-height multiple on v6e/v7x, 2x128
    # on v5e); for tiny B, round up to the 8-row sublane granule.
    TM = 256 if B >= 256 else _round_up(B, 8)
    B_pad = _round_up(B, TM)

    # Pad batch rows + feature lanes, cast activations to bf16 for fc1.
    xp = jnp.zeros((B_pad, IN_PAD), jnp.bfloat16)
    xp = xp.at[:B, :IN_DIM].set(x.astype(jnp.bfloat16))

    w1p, b1r, w2, b2r, w3, b3r, w4p, b4p = prepared
    args = (xp, w1p, b1r, w2, b2r, w3, b3r, w4p, b4p)

    # Weights/biases: constant block index across the batch grid -> resident
    # in VMEM, DMA'd once per call.
    def resident(a):
        return pl.BlockSpec(a.shape, lambda i: (0,) * a.ndim)

    out = pl.pallas_call(
        mlp_kernel,
        out_shape=jax.ShapeDtypeStruct((B_pad, OUT_PAD), jnp.float32),
        grid=(B_pad // TM,),
        in_specs=[pl.BlockSpec((TM, IN_PAD), lambda i: (i, 0))]
                 + [resident(a) for a in args[1:]],
        out_specs=pl.BlockSpec((TM, OUT_PAD), lambda i: (i, 0)),
        compiler_params=pltpu.CompilerParams(
            dimension_semantics=("parallel",),
            vmem_limit_bytes=48 << 20,
        ),
    )(*args)

    return out[:B, :NUM_CLASSES]


def init_params(key):
    """Deterministic init matching the nn.Linear shapes (stored as (in, out))."""
    def linear(k, fan_in, fan_out):
        kw, kb = jax.random.split(k)
        bound = 1.0 / jnp.sqrt(fan_in)
        w = jax.random.uniform(kw, (fan_in, fan_out), jnp.float32, -bound, bound)
        b = jax.random.uniform(kb, (fan_out,), jnp.float32, -bound, bound)
        return w, b

    k1, k2, k3, k4 = jax.random.split(key, 4)
    w1, b1 = linear(k1, IN_DIM, HID)
    w2, b2 = linear(k2, HID, HID)
    w3, b3 = linear(k3, HID, HID)
    w4, b4 = linear(k4, HID, NUM_CLASSES)
    return (w1, b1, w2, b2, w3, b3, w4, b4)


def mlp_reference_matched(x, prepared):
    """Pure-JAX reference matching the kernel's compute (bf16 fc1, f32 acc)."""
    w1p, b1r, w2, b2r, w3, b3r, w4p, b4p = prepared
    B = x.shape[0]
    xp = jnp.zeros((B, IN_PAD), jnp.bfloat16).at[:, :IN_DIM].set(
        x.astype(jnp.bfloat16))
    h = jnp.maximum(jnp.dot(xp, w1p, preferred_element_type=jnp.float32) + b1r, 0.0)
    h = jnp.maximum(jnp.dot(h, w2, preferred_element_type=jnp.float32) + b2r, 0.0)
    h = jnp.maximum(jnp.dot(h, w3, preferred_element_type=jnp.float32) + b3r, 0.0)
    out = jnp.dot(h, w4p, preferred_element_type=jnp.float32) + b4p
    return out[:, :NUM_CLASSES]


def mlp_reference_f32(x, params):
    """Full-precision reference of the original module (inference mode)."""
    w1, b1, w2, b2, w3, b3, w4, b4 = params
    h = jnp.maximum(x @ w1 + b1, 0.0)
    h = jnp.maximum(h @ w2 + b2, 0.0)
    h = jnp.maximum(h @ w3 + b3, 0.0)
    return h @ w4 + b4


if __name__ == "__main__":
    key = jax.random.PRNGKey(0)
    kx, kx2, kp = jax.random.split(key, 3)

    params = init_params(kp)
    prepared = prepare_params(params)

    # Small-batch case.
    B = 8
    x = jax.random.normal(kx, (B, IN_DIM), jnp.float32)
    out = jax.block_until_ready(mlp_forward(x, prepared))
    assert out.shape == (B, NUM_CLASSES), out.shape

    ref_m = mlp_reference_matched(x, prepared)
    assert jnp.allclose(out, ref_m, atol=2e-3, rtol=2e-3), \
        float(jnp.max(jnp.abs(out - ref_m)))
    ref_f32 = mlp_reference_f32(x, params)
    assert jnp.allclose(out, ref_f32, atol=5e-2, rtol=5e-2), \
        float(jnp.max(jnp.abs(out - ref_f32)))

    # Larger, non-tile-multiple batch exercises the grid + row padding path.
    B2 = 260
    x2 = jax.random.normal(kx2, (B2, IN_DIM), jnp.float32)
    out2 = jax.block_until_ready(mlp_forward(x2, prepared))
    assert out2.shape == (B2, NUM_CLASSES), out2.shape
    ref2 = mlp_reference_matched(x2, prepared)
    assert jnp.allclose(out2, ref2, atol=2e-3, rtol=2e-3), \
        float(jnp.max(jnp.abs(out2 - ref2)))

    print("KERNEL_OK")
</pallas_src>

<mosaic_0001>
module attributes {stable_mosaic.version = 11 : i64} {
  func.func @mlp_kernel(%arg0: i32, %arg1: memref<8x3968xbf16, #tpu.memory_space<vmem>>, %arg2: memref<3968x128xbf16, #tpu.memory_space<vmem>>, %arg3: memref<1x128xf32, #tpu.memory_space<vmem>>, %arg4: memref<128x128xf32, #tpu.memory_space<vmem>>, %arg5: memref<1x128xf32, #tpu.memory_space<vmem>>, %arg6: memref<128x128xf32, #tpu.memory_space<vmem>>, %arg7: memref<1x128xf32, #tpu.memory_space<vmem>>, %arg8: memref<128x128xf32, #tpu.memory_space<vmem>>, %arg9: memref<1x128xf32, #tpu.memory_space<vmem>>, %arg10: memref<8x128xf32, #tpu.memory_space<vmem>>) attributes {dimension_semantics = [#tpu.dimension_semantics<parallel>], iteration_bounds = array<i64: 1>, scalar_prefetch = 0 : i64, scratch_operands = 0 : i64, tpu.core_type = #tpu.core_type<tc>, window_params = [{transform_indices = @transform_0, window_bounds = array<i64: 8, 3968>}, {pipeline_mode = #tpu.pipeline_mode<synchronous>, transform_indices = @transform_1, window_bounds = array<i64: 3968, 128>}, {pipeline_mode = #tpu.pipeline_mode<synchronous>, transform_indices = @transform_2, window_bounds = array<i64: 1, 128>}, {pipeline_mode = #tpu.pipeline_mode<synchronous>, transform_indices = @transform_3, window_bounds = array<i64: 128, 128>}, {pipeline_mode = #tpu.pipeline_mode<synchronous>, transform_indices = @transform_4, window_bounds = array<i64: 1, 128>}, {pipeline_mode = #tpu.pipeline_mode<synchronous>, transform_indices = @transform_5, window_bounds = array<i64: 128, 128>}, {pipeline_mode = #tpu.pipeline_mode<synchronous>, transform_indices = @transform_6, window_bounds = array<i64: 1, 128>}, {pipeline_mode = #tpu.pipeline_mode<synchronous>, transform_indices = @transform_7, window_bounds = array<i64: 128, 128>}, {pipeline_mode = #tpu.pipeline_mode<synchronous>, transform_indices = @transform_8, window_bounds = array<i64: 1, 128>}, {transform_indices = @transform_9, window_bounds = array<i64: 8, 128>}]} {
    %c0 = arith.constant 0 : index
    %c0_0 = arith.constant 0 : index
    %0 = vector.load %arg1[%c0, %c0_0] : memref<8x3968xbf16, #tpu.memory_space<vmem>>, vector<8x3968xbf16>
    %c0_1 = arith.constant 0 : index
    %c0_2 = arith.constant 0 : index
    %1 = vector.load %arg2[%c0_1, %c0_2] : memref<3968x128xbf16, #tpu.memory_space<vmem>>, vector<3968x128xbf16>
    %cst = arith.constant dense<0.000000e+00> : vector<8x128xf32>
    %2 = tpu.matmul %0, %1, %cst {dimension_numbers = #tpu.dot_dimension_numbers<[1], [0], [0], [1], [0, 0, 1, 1], [], []>} : vector<8x3968xbf16>, vector<3968x128xbf16>, vector<8x128xf32> -> vector<8x128xf32>
    %c0_3 = arith.constant 0 : index
    %c0_4 = arith.constant 0 : index
    %3 = vector.load %arg3[%c0_3, %c0_4] : memref<1x128xf32, #tpu.memory_space<vmem>>, vector<1x128xf32>
    %4 = vector.broadcast %3 : vector<1x128xf32> to vector<8x128xf32>
    %5 = arith.addf %2, %4 : vector<8x128xf32>
    %cst_5 = arith.constant 0.000000e+00 : f32
    %6 = vector.broadcast %cst_5 : f32 to vector<8x128xf32>
    %7 = arith.maximumf %5, %6 : vector<8x128xf32>
    %c0_6 = arith.constant 0 : index
    %c0_7 = arith.constant 0 : index
    %8 = vector.load %arg4[%c0_6, %c0_7] : memref<128x128xf32, #tpu.memory_space<vmem>>, vector<128x128xf32>
    %cst_8 = arith.constant dense<0.000000e+00> : vector<8x128xf32>
    %9 = tpu.matmul %7, %8, %cst_8 {dimension_numbers = #tpu.dot_dimension_numbers<[1], [0], [0], [1], [0, 0, 1, 1], [], []>} : vector<8x128xf32>, vector<128x128xf32>, vector<8x128xf32> -> vector<8x128xf32>
    %c0_9 = arith.constant 0 : index
    %c0_10 = arith.constant 0 : index
    %10 = vector.load %arg5[%c0_9, %c0_10] : memref<1x128xf32, #tpu.memory_space<vmem>>, vector<1x128xf32>
    %11 = vector.broadcast %10 : vector<1x128xf32> to vector<8x128xf32>
    %12 = arith.addf %9, %11 : vector<8x128xf32>
    %cst_11 = arith.constant 0.000000e+00 : f32
    %13 = vector.broadcast %cst_11 : f32 to vector<8x128xf32>
    %14 = arith.maximumf %12, %13 : vector<8x128xf32>
    %c0_12 = arith.constant 0 : index
    %c0_13 = arith.constant 0 : index
    %15 = vector.load %arg6[%c0_12, %c0_13] : memref<128x128xf32, #tpu.memory_space<vmem>>, vector<128x128xf32>
    %cst_14 = arith.constant dense<0.000000e+00> : vector<8x128xf32>
    %16 = tpu.matmul %14, %15, %cst_14 {dimension_numbers = #tpu.dot_dimension_numbers<[1], [0], [0], [1], [0, 0, 1, 1], [], []>} : vector<8x128xf32>, vector<128x128xf32>, vector<8x128xf32> -> vector<8x128xf32>
    %c0_15 = arith.constant 0 : index
    %c0_16 = arith.constant 0 : index
    %17 = vector.load %arg7[%c0_15, %c0_16] : memref<1x128xf32, #tpu.memory_space<vmem>>, vector<1x128xf32>
    %18 = vector.broadcast %17 : vector<1x128xf32> to vector<8x128xf32>
    %19 = arith.addf %16, %18 : vector<8x128xf32>
    %cst_17 = arith.constant 0.000000e+00 : f32
    %20 = vector.broadcast %cst_17 : f32 to vector<8x128xf32>
    %21 = arith.maximumf %19, %20 : vector<8x128xf32>
    %c0_18 = arith.constant 0 : index
    %c0_19 = arith.constant 0 : index
    %22 = vector.load %arg8[%c0_18, %c0_19] : memref<128x128xf32, #tpu.memory_space<vmem>>, vector<128x128xf32>
    %cst_20 = arith.constant dense<0.000000e+00> : vector<8x128xf32>
    %23 = tpu.matmul %21, %22, %cst_20 {dimension_numbers = #tpu.dot_dimension_numbers<[1], [0], [0], [1], [0, 0, 1, 1], [], []>} : vector<8x128xf32>, vector<128x128xf32>, vector<8x128xf32> -> vector<8x128xf32>
    %c0_21 = arith.constant 0 : index
    %c0_22 = arith.constant 0 : index
    %24 = vector.load %arg9[%c0_21, %c0_22] : memref<1x128xf32, #tpu.memory_space<vmem>>, vector<1x128xf32>
    %25 = vector.broadcast %24 : vector<1x128xf32> to vector<8x128xf32>
    %26 = arith.addf %23, %25 : vector<8x128xf32>
    %c0_23 = arith.constant 0 : index
    %c0_24 = arith.constant 0 : index
    %27 = vector.load %arg10[%c0_23, %c0_24] : memref<8x128xf32, #tpu.memory_space<vmem>>, vector<8x128xf32>
    tpu.vector_store %arg10[%c0_23, %c0_24], %26 {strides = array<i32>} : memref<8x128xf32, #tpu.memory_space<vmem>>, vector<8x128xf32>,
    return
  }
  func.func @transform_0(%arg0: i32) -> (i32, i32) {
    %c0_i32 = arith.constant 0 : i32
    %c0_i32_0 = arith.constant 0 : i32
    return %arg0, %c0_i32 : i32, i32
  }
  func.func @transform_1(%arg0: i32) -> (i32, i32) {
    %c0_i32 = arith.constant 0 : i32
    %c0_i32_0 = arith.constant 0 : i32
    %c0_i32_1 = arith.constant 0 : i32
    return %c0_i32, %c0_i32_0 : i32, i32
  }
  func.func @transform_2(%arg0: i32) -> (i32, i32) {
    %c0_i32 = arith.constant 0 : i32
    %c0_i32_0 = arith.constant 0 : i32
    %c0_i32_1 = arith.constant 0 : i32
    return %c0_i32, %c0_i32_0 : i32, i32
  }
  func.func @transform_3(%arg0: i32) -> (i32, i32) {
    %c0_i32 = arith.constant 0 : i32
    %c0_i32_0 = arith.constant 0 : i32
    %c0_i32_1 = arith.constant 0 : i32
    return %c0_i32, %c0_i32_0 : i32, i32
  }
  func.func @transform_4(%arg0: i32) -> (i32, i32) {
    %c0_i32 = arith.constant 0 : i32
    %c0_i32_0 = arith.constant 0 : i32
    %c0_i32_1 = arith.constant 0 : i32
    return %c0_i32, %c0_i32_0 : i32, i32
  }
  func.func @transform_5(%arg0: i32) -> (i32, i32) {
    %c0_i32 = arith.constant 0 : i32
    %c0_i32_0 = arith.constant 0 : i32
    %c0_i32_1 = arith.constant 0 : i32
    return %c0_i32, %c0_i32_0 : i32, i32
  }
  func.func @transform_6(%arg0: i32) -> (i32, i32) {
    %c0_i32 = arith.constant 0 : i32
    %c0_i32_0 = arith.constant 0 : i32
    %c0_i32_1 = arith.constant 0 : i32
    return %c0_i32, %c0_i32_0 : i32, i32
  }
  func.func @transform_7(%arg0: i32) -> (i32, i32) {
    %c0_i32 = arith.constant 0 : i32
    %c0_i32_0 = arith.constant 0 : i32
    %c0_i32_1 = arith.constant 0 : i32
    return %c0_i32, %c0_i32_0 : i32, i32
  }
  func.func @transform_8(%arg0: i32) -> (i32, i32) {
    %c0_i32 = arith.constant 0 : i32
    %c0_i32_0 = arith.constant 0 : i32
    %c0_i32_1 = arith.constant 0 : i32
    return %c0_i32, %c0_i32_0 : i32, i32
  }
  func.func @transform_9(%arg0: i32) -> (i32, i32) {
    %c0_i32 = arith.constant 0 : i32
    %c0_i32_0 = arith.constant 0 : i32
    return %arg0, %c0_i32 : i32, i32
  }
}

</mosaic_0001>

<bundles_post_ra>
// kernel: tpu_custom_call.1
= control target key start
LH: loop header
LB: loop body
LE: loop exit
PB: predicated region body
PF: predicated region fallthrough
CT: control target
= control target key end

     0   :  { %14 = vsyncpa [#allocation3], 0  ;;  %s4267_s0 = inlined_call_operand.hbm [shape: bf16[8,3968], index: 0, kind: input, shape index: {}]   ;;  %s4268_s1 = inlined_call_operand.hbm [shape: bf16[3968,128], index: 1, kind: input, shape index: {}]   ;;  %s4269_s2 = inlined_call_operand.vmem [shape: f32[1,128], index: 2, kind: input, shape index: {}]   ;;  %s4270_s3 = inlined_call_operand.hbm [shape: f32[128,128], index: 3, kind: input, shape index: {}]   ;;  %s4271_s4 = inlined_call_operand.vmem [shape: f32[1,128], index: 4, kind: input, shape index: {}]   ;;  %s4272_s5 = inlined_call_operand.hbm [shape: f32[128,128], index: 5, kind: input, shape index: {}]   ;;  %s4273_s6 = inlined_call_operand.vmem [shape: f32[1,128], index: 6, kind: input, shape index: {}]   ;;  %s4274_s7 = inlined_call_operand.hbm [shape: f32[128,128], index: 7, kind: input, shape index: {}]   ;;  %s4275_s8 = inlined_call_operand.vmem [shape: f32[1,128], index: 8, kind: input, shape index: {}]   ;;  %s4276_s9 = inlined_call_operand.hbm [shape: f32[8,128], index: 9, kind: output, shape index: {}]  }
   0x1   :  { %15 = vsyncpa [#allocation6], 0 }
   0x2   :  { %16 = vsyncpa [#allocation9], 0  ;;  %s33_s11 = sshll.u32 %s4268_s1, 4  ;;  %s34_s11 = int_to_ptr.hbm [resolvable:$true] %s33_s11 }
   0x3   :  { %17 = vsyncpa [#allocation4], 0  ;;  %s4174_s12 = smov [#allocation5]   ;;  %s4175_s14 = smov 64  }
   0x4   :  { %s35_s13 = sshll.u32 %s4174_s12, 4  ;;  %s4176_s15 = smov 4   ;;  %s36_s13 = int_to_ptr.vmem [resolvable:$true] %s35_s13 }
   0x5   :  { %41 = dma.hbm_to_vmem [thread:$0]  %s34_s11, 31744, %s36_s13, [#allocation6], %s4175_s14, %s4175_s14, %s4176_s15  }
   0x6   :  { %s63_s18 = sshll.u32 %s4272_s5, 4  ;;  %s4177_s19 = smov [#allocation8]   ;;  %s64_s18 = int_to_ptr.hbm [resolvable:$true] %s63_s18 }
   0x7   :  { %s65_s20 = sshll.u32 %s4177_s19, 4  ;;  %s23_s23 = sshll.u32 %s4267_s0, 4  ;;  %s66_s20 = int_to_ptr.vmem [resolvable:$true] %s65_s20  ;;  %s24_s23 = int_to_ptr.hbm [resolvable:$true] %s23_s23 }
   0x8   :  { %s4178_s1 = smov 128   ;;  %s4179_s24 = smov 8  }
   0x9   :  { %71 = dma.hbm_to_vmem [thread:$0]  %s64_s18, 2048, %s66_s20, [#allocation9], %s4178_s1, %s4178_s1, %s4179_s24  }
   0xa   :  { %s48_s27 = sshll.u32 %s4270_s3, 4  ;;  %s4180_s28 = smov [#allocation2]   ;;  %s49_s27 = int_to_ptr.hbm [resolvable:$true] %s48_s27 }
   0xb   :  { %s25_s29 = sshll.u32 %s4180_s28, 4  ;;  %s4181_s5 = smov [#allocation7]   ;;  %s26_s29 = int_to_ptr.vmem [resolvable:$true] %s25_s29 }
   0xc   :  { %28 = dma.hbm_to_vmem [thread:$0]  %s24_s23, 1984, %s26_s29, [#allocation3]  }
   0xd   :  { %s50_s30 = sshll.u32 %s4181_s5, 4  ;;  %s78_s0 = sshll.u32 %s4274_s7, 4  ;;  %s51_s30 = int_to_ptr.vmem [resolvable:$true] %s50_s30  ;;  %s79_s0 = int_to_ptr.hbm [resolvable:$true] %s78_s0 }
   0xe   :  { %56 = dma.hbm_to_vmem [thread:$0]  %s49_s27, 2048, %s51_s30, [#allocation6], %s4178_s1, %s4178_s1, %s4179_s24  }
   0xf   :  { %s4182_s12 = smov [#allocation10]  }
  0x10   :  { %s80_s13 = sshll.u32 %s4182_s12, 4  ;;  %s81_s13 = int_to_ptr.vmem [resolvable:$true] %s80_s13 }
  0x11   :  { %86 = dma.hbm_to_vmem [thread:$0]  %s79_s0, 2048, %s81_s13, [#allocation9], %s4178_s1, %s4178_s1, %s4179_s24  }
  0x12   :  { %4166 = dma.done.wait [#allocation3], 1984  }
  0x13   :  { %4167 = vsyncadd [#allocation3], 4294965312 }
  0x14   :  { %4168 = dma.done.wait [#allocation6], 33792  }
  0x15   :  { %4169 = vsyncadd [#allocation6], 4294933504 }
  0x16   :  { %4170 = dma.done.wait [#allocation9], 4096  }
  0x17   :  { %4171 = vsyncadd [#allocation9], 4294963200  ;;  %v3767_v0 = vld [vmem:[#allocation5 + $0x38] sm:$0xff]  ;;  %v3766_v4 = vld [vmem:[#allocation5 + $0x30] sm:$0xff]  ;;  %s4183_s18 = smov [#allocation11]   ;;  %s2756_s22 = sshll.u32 %s4276_s9, 4  ;;  %s2757_s22 = int_to_ptr.hbm [resolvable:$true] %s2756_s22 }
  0x18   :  { %v3775_v1 = vld [vmem:[#allocation5 + $0x78] sm:$0xff]  ;;  %2222 = vmatpush.bf16.msra.mxu0 %v3767_v0  ;;  %v3774_v5 = vld [vmem:[#allocation5 + $0x70] sm:$0xff]  ;;  %v3765_v8 = vld [vmem:[#allocation5 + $0x28] sm:$0xff]  ;;  %s2754_s19 = sshll.u32 %s4183_s18, 4  ;;  %s2755_s19 = int_to_ptr.vmem [resolvable:$true] %s2754_s19 }
  0x19   :  { %v3783_v2 = vld [vmem:[#allocation5 + $0xb8] sm:$0xff]  ;;  %2235 = vmatpush.bf16.msra.mxu1 %v3775_v1  ;;  %v3782_v6 = vld [vmem:[#allocation5 + $0xb0] sm:$0xff]  ;;  %v3773_v9 = vld [vmem:[#allocation5 + $0x68] sm:$0xff] }
  0x1a   :  { %v3791_v3 = vld [vmem:[#allocation5 + $0xf8] sm:$0xff]  ;;  %2248 = vmatpush.bf16.msra.mxu2 %v3783_v2  ;;  %v3790_v7 = vld [vmem:[#allocation5 + $0xf0] sm:$0xff]  ;;  %v3781_v10 = vld [vmem:[#allocation5 + $0xa8] sm:$0xff] }
  0x1b   :  { %2261 = vmatpush.bf16.msra.mxu3 %v3791_v3  ;;  %v3789_v11 = vld [vmem:[#allocation5 + $0xe8] sm:$0xff]  ;;  %v3764_v12 = vld [vmem:[#allocation5 + $0x20] sm:$0xff]  ;;  %v3763_v16 = vld [vmem:[#allocation5 + $0x18] sm:$0xff] }
  0x1c   :  { %2223 = vmatpush.bf16.msra.mxu0 %v3766_v4  ;;  %v3772_v13 = vld [vmem:[#allocation5 + $0x60] sm:$0xff]  ;;  %v3771_v17 = vld [vmem:[#allocation5 + $0x58] sm:$0xff]  ;;  %v3762_v20 = vld [vmem:[#allocation5 + $0x10] sm:$0xff] }
  0x1d   :  { %2236 = vmatpush.bf16.msra.mxu1 %v3774_v5  ;;  %v3780_v14 = vld [vmem:[#allocation5 + $0xa0] sm:$0xff]  ;;  %v3779_v18 = vld [vmem:[#allocation5 + $0x98] sm:$0xff]  ;;  %v3770_v21 = vld [vmem:[#allocation5 + $0x50] sm:$0xff] }
  0x1e   :  { %2249 = vmatpush.bf16.msra.mxu2 %v3782_v6  ;;  %v3788_v15 = vld [vmem:[#allocation5 + $0xe0] sm:$0xff]  ;;  %v3787_v19 = vld [vmem:[#allocation5 + $0xd8] sm:$0xff]  ;;  %v3778_v22 = vld [vmem:[#allocation5 + $0x90] sm:$0xff] }
  0x1f   :  { %2262 = vmatpush.bf16.msra.mxu3 %v3790_v7  ;;  %v3786_v23 = vld [vmem:[#allocation5 + $0xd0] sm:$0xff]  ;;  %v3761_v24 = vld [vmem:[#allocation5 + $0x8] sm:$0xff]  ;;  %v3760_v31 = vld [vmem:[#allocation5] sm:$0xff] }
  0x20   :  { %2224 = vmatpush.bf16.msra.mxu0 %v3765_v8  ;;  %v3769_v25 = vld [vmem:[#allocation5 + $0x48] sm:$0xff]  ;;  %v3768_v32 = vld [vmem:[#allocation5 + $0x40] sm:$0xff]  ;;  %v3799_v35 = vld [vmem:[#allocation5 + $0x138] sm:$0xff] }
  0x21   :  { %2237 = vmatpush.bf16.msra.mxu1 %v3773_v9  ;;  %v109_v26 = vld [vmem:[#allocation2] sm:$0xff]  ;;  %v110_v29 = vld [vmem:[#allocation2 + $0x8] sm:$0xff]  ;;  %v3807_v37 = vld [vmem:[#allocation5 + $0x178] sm:$0xff] }
  0x22   :  { %2250 = vmatpush.bf16.msra.mxu2 %v3781_v10  ;;  %v3777_v27 = vld [vmem:[#allocation5 + $0x88] sm:$0xff]  ;;  %v641_v30 = vunpack.c.l.b16 %v109_v26  ;;  %v643_v33 = vunpack.c.l.b16 %v110_v29  ;;  %v3776_v34 = vld [vmem:[#allocation5 + $0x80] sm:$0xff]  ;;  %v642_v36 = vunpack.c.h.b16 %v109_v26  ;;  %v3815_v38 = vld [vmem:[#allocation5 + $0x1b8] sm:$0xff]  ;;  %v644_v41 = vunpack.c.h.b16 %v110_v29 }
  0x23   :  { %2263 = vmatpush.bf16.msra.mxu3 %v3789_v11  ;;  %v3785_v28 = vld [vmem:[#allocation5 + $0xc8] sm:$0xff]  ;;  %v3784_v39 = vld [vmem:[#allocation5 + $0xc0] sm:$0xff]  ;;  %v3823_v42 = vld [vmem:[#allocation5 + $0x1f8] sm:$0xff] }
  0x24   :  { %2225 = vmatpush.bf16.msra.mxu0 %v3764_v12  ;;  %v672_v40 = vpack.c.b16 %v641_v30, %v641_v30  ;;  %v674_v43 = vpack.c.b16 %v643_v33, %v643_v33  ;;  %v3798_v44 = vld [vmem:[#allocation5 + $0x130] sm:$0xff]  ;;  %v673_v45 = vpack.c.b16 %v642_v36, %v642_v36  ;;  %v675_v48 = vpack.c.b16 %v644_v41, %v644_v41  ;;  %v3797_v50 = vld [vmem:[#allocation5 + $0x128] sm:$0xff]  ;;  %v3796_v54 = vld [vmem:[#allocation5 + $0x120] sm:$0xff] }
  0x25   :  { %2238 = vmatpush.bf16.msra.mxu1 %v3772_v13  ;;  %v3806_v46 = vld [vmem:[#allocation5 + $0x170] sm:$0xff]  ;;  %v3805_v51 = vld [vmem:[#allocation5 + $0x168] sm:$0xff]  ;;  %v3804_v55 = vld [vmem:[#allocation5 + $0x160] sm:$0xff] }
  0x26   :  { %2251 = vmatpush.bf16.msra.mxu2 %v3780_v14  ;;  %v3814_v47 = vld [vmem:[#allocation5 + $0x1b0] sm:$0xff]  ;;  %v3813_v52 = vld [vmem:[#allocation5 + $0x1a8] sm:$0xff]  ;;  %v3812_v56 = vld [vmem:[#allocation5 + $0x1a0] sm:$0xff] }
  0x27   :  { %2264 = vmatpush.bf16.msra.mxu3 %v3788_v15  ;;  %v3822_v49 = vld [vmem:[#allocation5 + $0x1f0] sm:$0xff]  ;;  %v3821_v53 = vld [vmem:[#allocation5 + $0x1e8] sm:$0xff]  ;;  %v3820_v57 = vld [vmem:[#allocation5 + $0x1e0] sm:$0xff] }
  0x28   :  { %2226 = vmatpush.bf16.msra.mxu0 %v3763_v16  ;;  %v3795_v58 = vld [vmem:[#allocation5 + $0x118] sm:$0xff]  ;;  %v3794_v62 = vld [vmem:[#allocation5 + $0x110] sm:$0xff]  ;;  %v3793_v2 = vld [vmem:[#allocation5 + $0x108] sm:$0xff] }
  0x29   :  { %2239 = vmatpush.bf16.msra.mxu1 %v3771_v17  ;;  %v3803_v59 = vld [vmem:[#allocation5 + $0x158] sm:$0xff]  ;;  %v3802_v63 = vld [vmem:[#allocation5 + $0x150] sm:$0xff]  ;;  %v3801_v3 = vld [vmem:[#allocation5 + $0x148] sm:$0xff] }
  0x2a   :  { %2252 = vmatpush.bf16.msra.mxu2 %v3779_v18  ;;  %v3811_v60 = vld [vmem:[#allocation5 + $0x198] sm:$0xff]  ;;  %v3810_v0 = vld [vmem:[#allocation5 + $0x190] sm:$0xff]  ;;  %v3809_v4 = vld [vmem:[#allocation5 + $0x188] sm:$0xff] }
  0x2b   :  { %2265 = vmatpush.bf16.msra.mxu3 %v3787_v19  ;;  %v3819_v61 = vld [vmem:[#allocation5 + $0x1d8] sm:$0xff]  ;;  %v3818_v1 = vld [vmem:[#allocation5 + $0x1d0] sm:$0xff]  ;;  %v3817_v7 = vld [vmem:[#allocation5 + $0x1c8] sm:$0xff] }
  0x2c   :  { %2227 = vmatpush.bf16.msra.mxu0 %v3762_v20  ;;  %v112_v5 = vld [vmem:[#allocation2 + $0x18] sm:$0xff]  ;;  %v111_v6 = vld [vmem:[#allocation2 + $0x10] sm:$0xff]  ;;  %v3837_v29 = vld [vmem:[#allocation5 + $0x268] sm:$0xff] }
  0x2d   :  { %2240 = vmatpush.bf16.msra.mxu1 %v3770_v21  ;;  %v3792_v8 = vld [vmem:[#allocation5 + $0x100] sm:$0xff]  ;;  %v647_v9 = vunpack.c.l.b16 %v112_v5  ;;  %v645_v12 = vunpack.c.l.b16 %v111_v6  ;;  %v646_v13 = vunpack.c.h.b16 %v111_v6  ;;  %v3831_v14 = vld [vmem:[#allocation5 + $0x238] sm:$0xff]  ;;  %v648_v18 = vunpack.c.h.b16 %v112_v5  ;;  %v3845_v30 = vld [vmem:[#allocation5 + $0x2a8] sm:$0xff] }
  0x2e   :  { %2253 = vmatpush.bf16.msra.mxu2 %v3778_v22  ;;  %v3800_v10 = vld [vmem:[#allocation5 + $0x140] sm:$0xff]  ;;  %v3839_v15 = vld [vmem:[#allocation5 + $0x278] sm:$0xff]  ;;  %v3834_v41 = vld [vmem:[#allocation5 + $0x250] sm:$0xff] }
  0x2f   :  { %2266 = vmatpush.bf16.msra.mxu3 %v3786_v23  ;;  %v3808_v11 = vld [vmem:[#allocation5 + $0x180] sm:$0xff]  ;;  %v3847_v16 = vld [vmem:[#allocation5 + $0x2b8] sm:$0xff]  ;;  %v678_v20 = vpack.c.b16 %v647_v9, %v647_v9  ;;  %v676_v21 = vpack.c.b16 %v645_v12, %v645_v12  ;;  %v677_v22 = vpack.c.b16 %v646_v13, %v646_v13  ;;  %v3830_v23 = vld [vmem:[#allocation5 + $0x230] sm:$0xff]  ;;  %v679_v26 = vpack.c.b16 %v648_v18, %v648_v18 }
  0x30   :  { %2228 = vmatpush.bf16.msra.mxu0 %v3761_v24  ;;  %v3816_v17 = vld [vmem:[#allocation5 + $0x1c0] sm:$0xff]  ;;  %v3855_v19 = vld [vmem:[#allocation5 + $0x2f8] sm:$0xff]  ;;  %v3838_v24 = vld [vmem:[#allocation5 + $0x270] sm:$0xff] }
  0x31   :  { %2241 = vmatpush.bf16.msra.mxu1 %v3769_v25  ;;  %v3846_v25 = vld [vmem:[#allocation5 + $0x2b0] sm:$0xff]  ;;  %v3836_v33 = vld [vmem:[#allocation5 + $0x260] sm:$0xff]  ;;  %v3827_v36 = vld [vmem:[#allocation5 + $0x218] sm:$0xff] }
  0x32   :  { %2254 = vmatpush.bf16.msra.mxu2 %v3777_v27  ;;  %v3854_v27 = vld [vmem:[#allocation5 + $0x2f0] sm:$0xff]  ;;  %v3861_v6 = vld [vmem:[#allocation5 + $0x328] sm:$0xff]  ;;  %v3876_v12 = vld [vmem:[#allocation5 + $0x3a0] sm:$0xff] }
  0x33   :  { %2267 = vmatpush.bf16.msra.mxu3 %v3785_v28  ;;  %v3829_v28 = vld [vmem:[#allocation5 + $0x228] sm:$0xff]  ;;  %v3886_v5 = vld [vmem:[#allocation5 + $0x3f0] sm:$0xff]  ;;  %v3884_v13 = vld [vmem:[#allocation5 + $0x3e0] sm:$0xff] }
  0x34   :  { %2229 = vmatpush.bf16.msra.mxu0 %v3760_v31  ;;  %v3853_v31 = vld [vmem:[#allocation5 + $0x2e8] sm:$0xff]  ;;  %v3858_v18 = vld [vmem:[#allocation5 + $0x310] sm:$0xff] }
  0x35   :  { %2242 = vmatpush.bf16.msra.mxu1 %v3768_v32  ;;  %v3828_v32 = vld [vmem:[#allocation5 + $0x220] sm:$0xff]  ;;  %v3885_v9 = vld [vmem:[#allocation5 + $0x3e8] sm:$0xff] }
  0x36   :  { %2255 = vmatpush.bf16.msra.mxu2 %v3776_v34  ;;  %v3844_v34 = vld [vmem:[#allocation5 + $0x2a0] sm:$0xff] }
  0x37   :  { %2268 = vmatpush.bf16.msra.mxu3 %v3784_v39  ;;  %2230 = vmatmul.bf16.vlgmr.msra.gmra.mxu0 %v672_v40  ;;  %v3851_v39 = vld [vmem:[#allocation5 + $0x2d8] sm:$0xff]  ;;  %v3826_v40 = vld [vmem:[#allocation5 + $0x210] sm:$0xff] }
  0x38   :  { %2274 = vmatpush.bf16.msrb.mxu0 %v3799_v35  ;;  %2243 = vmatmul.bf16.vlgmr.msra.gmra.mxu1 %v673_v45  ;;  %v3852_v35 = vld [vmem:[#allocation5 + $0x2e0] sm:$0xff]  ;;  %v3833_v45 = vld [vmem:[#allocation5 + $0x248] sm:$0xff] }
  0x39   :  { %2287 = vmatpush.bf16.msrb.mxu1 %v3807_v37  ;;  %2256 = vmatmul.bf16.vlgmr.msra.gmra.mxu2 %v674_v43  ;;  %v3835_v37 = vld [vmem:[#allocation5 + $0x258] sm:$0xff]  ;;  %v3850_v43 = vld [vmem:[#allocation5 + $0x2d0] sm:$0xff] }
  0x3a   :  { %2300 = vmatpush.bf16.msrb.mxu2 %v3815_v38  ;;  %2269 = vmatmul.bf16.vlgmr.msra.gmra.mxu3 %v675_v48  ;;  %v3843_v38 = vld [vmem:[#allocation5 + $0x298] sm:$0xff]  ;;  %v114_v48 = vld [vmem:[#allocation2 + $0x28] sm:$0xff] }
  0x3b   :  { %2313 = vmatpush.bf16.msrb.mxu3 %v3823_v42  ;;  %v3842_v42 = vld [vmem:[#allocation5 + $0x290] sm:$0xff] }
  0x3c   :  { %2275 = vmatpush.bf16.msrb.mxu0 %v3798_v44  ;;  %v3825_v44 = vld [vmem:[#allocation5 + $0x208] sm:$0xff] }
  0x3d   :  { %2288 = vmatpush.bf16.msrb.mxu1 %v3806_v46  ;;  %v113_v46 = vld [vmem:[#allocation2 + $0x20] sm:$0xff] }
  0x3e   :  { %2301 = vmatpush.bf16.msrb.mxu2 %v3814_v47  ;;  %v3841_v47 = vld [vmem:[#allocation5 + $0x288] sm:$0xff] }
  0x3f   :  { %2314 = vmatpush.bf16.msrb.mxu3 %v3822_v49  ;;  %v3849_v49 = vld [vmem:[#allocation5 + $0x2c8] sm:$0xff] }
  0x40   :  { %2276 = vmatpush.bf16.msrb.mxu0 %v3797_v50  ;;  %v649_v50 = vunpack.c.l.b16 %v113_v46 }
  0x41   :  { %2289 = vmatpush.bf16.msrb.mxu1 %v3805_v51  ;;  %v3824_v51 = vld [vmem:[#allocation5 + $0x200] sm:$0xff] }
  0x42   :  { %2302 = vmatpush.bf16.msrb.mxu2 %v3813_v52  ;;  %v3832_v52 = vld [vmem:[#allocation5 + $0x240] sm:$0xff] }
  0x43   :  { %2315 = vmatpush.bf16.msrb.mxu3 %v3821_v53  ;;  %v651_v53 = vunpack.c.l.b16 %v114_v48 }
  0x44   :  { %2277 = vmatpush.bf16.msrb.mxu0 %v3796_v54  ;;  %v3840_v54 = vld [vmem:[#allocation5 + $0x280] sm:$0xff] }
  0x45   :  { %2290 = vmatpush.bf16.msrb.mxu1 %v3804_v55  ;;  %v3863_v55 = vld [vmem:[#allocation5 + $0x338] sm:$0xff] }
  0x46   :  { %2303 = vmatpush.bf16.msrb.mxu2 %v3812_v56  ;;  %v650_v56 = vunpack.c.h.b16 %v113_v46  ;;  %v3910_v46 = vld [vmem:[#allocation5 + $0x4b0] sm:$0xff] }
  0x47   :  { %2316 = vmatpush.bf16.msrb.mxu3 %v3820_v57  ;;  %v3871_v57 = vld [vmem:[#allocation5 + $0x378] sm:$0xff] }
  0x48   :  { %2278 = vmatpush.bf16.msrb.mxu0 %v3795_v58  ;;  %v3879_v58 = vld [vmem:[#allocation5 + $0x3b8] sm:$0xff] }
  0x49   :  { %2291 = vmatpush.bf16.msrb.mxu1 %v3803_v59  ;;  %v652_v59 = vunpack.c.h.b16 %v114_v48  ;;  %v3893_v48 = vld [vmem:[#allocation5 + $0x428] sm:$0xff] }
  0x4a   :  { %2304 = vmatpush.bf16.msrb.mxu2 %v3811_v60  ;;  %v3848_v60 = vld [vmem:[#allocation5 + $0x2c0] sm:$0xff] }
  0x4b   :  { %2317 = vmatpush.bf16.msrb.mxu3 %v3819_v61  ;;  %v680_v61 = vpack.c.b16 %v649_v50, %v649_v50  ;;  %v3909_v50 = vld [vmem:[#allocation5 + $0x4a8] sm:$0xff] }
  0x4c   :  { %2279 = vmatpush.bf16.msrb.mxu0 %v3794_v62  ;;  %v682_v62 = vpack.c.b16 %v651_v53, %v651_v53  ;;  %v3900_v53 = vld [vmem:[#allocation5 + $0x460] sm:$0xff] }
  0x4d   :  { %2292 = vmatpush.bf16.msrb.mxu1 %v3802_v63  ;;  %v3887_v63 = vld [vmem:[#allocation5 + $0x3f8] sm:$0xff] }
  0x4e   :  { %2305 = vmatpush.bf16.msrb.mxu2 %v3810_v0  ;;  %v681_v0 = vpack.c.b16 %v650_v56, %v650_v56  ;;  %v3891_v56 = vld [vmem:[#allocation5 + $0x418] sm:$0xff] }
  0x4f   :  { %2318 = vmatpush.bf16.msrb.mxu3 %v3818_v1  ;;  %v3862_v1 = vld [vmem:[#allocation5 + $0x330] sm:$0xff] }
  0x50   :  { %2280 = vmatpush.bf16.msrb.mxu0 %v3793_v2  ;;  %v683_v2 = vpack.c.b16 %v652_v59, %v652_v59  ;;  %v3915_v59 = vld [vmem:[#allocation5 + $0x4d8] sm:$0xff] }
  0x51   :  { %2293 = vmatpush.bf16.msrb.mxu1 %v3801_v3  ;;  %v3870_v3 = vld [vmem:[#allocation5 + $0x370] sm:$0xff] }
  0x52   :  { %2306 = vmatpush.bf16.msrb.mxu2 %v3809_v4  ;;  %v3878_v4 = vld [vmem:[#allocation5 + $0x3b0] sm:$0xff] }
  0x53   :  { %2319 = vmatpush.bf16.msrb.mxu3 %v3817_v7  ;;  %v3869_v7 = vld [vmem:[#allocation5 + $0x368] sm:$0xff] }
  0x54   :  { %2281 = vmatpush.bf16.msrb.mxu0 %v3792_v8  ;;  %v3877_v8 = vld [vmem:[#allocation5 + $0x3a8] sm:$0xff] }
  0x55   :  { %2294 = vmatpush.bf16.msrb.mxu1 %v3800_v10  ;;  %v3860_v10 = vld [vmem:[#allocation5 + $0x320] sm:$0xff] }
  0x56   :  { %2307 = vmatpush.bf16.msrb.mxu2 %v3808_v11  ;;  %v3868_v11 = vld [vmem:[#allocation5 + $0x360] sm:$0xff] }
  0x57   :  { %2320 = vmatpush.bf16.msrb.mxu3 %v3816_v17  ;;  %2282 = vmatmul.bf16.vlgmr.msrb.gmra.mxu0 %v676_v21  ;;  %v3883_v17 = vld [vmem:[#allocation5 + $0x3d8] sm:$0xff]  ;;  %v3882_v21 = vld [vmem:[#allocation5 + $0x3d0] sm:$0xff] }
  0x58   :  { %2326 = vmatpush.bf16.msra.mxu0 %v3831_v14  ;;  %2295 = vmatmul.bf16.vlgmr.msrb.gmra.mxu1 %v677_v22  ;;  %v3859_v14 = vld [vmem:[#allocation5 + $0x318] sm:$0xff]  ;;  %v3857_v22 = vld [vmem:[#allocation5 + $0x308] sm:$0xff] }
  0x59   :  { %2339 = vmatpush.bf16.msra.mxu1 %v3839_v15  ;;  %2308 = vmatmul.bf16.vlgmr.msrb.gmra.mxu2 %v678_v20  ;;  %v3867_v15 = vld [vmem:[#allocation5 + $0x358] sm:$0xff]  ;;  %v3874_v20 = vld [vmem:[#allocation5 + $0x390] sm:$0xff] }
  0x5a   :  { %2352 = vmatpush.bf16.msra.mxu2 %v3847_v16  ;;  %2321 = vmatmul.bf16.vlgmr.msrb.gmra.mxu3 %v679_v26  ;;  %v3875_v16 = vld [vmem:[#allocation5 + $0x398] sm:$0xff] }
  0x5b   :  { %2365 = vmatpush.bf16.msra.mxu3 %v3855_v19  ;;  %v3866_v19 = vld [vmem:[#allocation5 + $0x350] sm:$0xff]  ;;  %v116_v26 = vld [vmem:[#allocation2 + $0x38] sm:$0xff] }
  0x5c   :  { %2327 = vmatpush.bf16.msra.mxu0 %v3830_v23  ;;  %v3865_v23 = vld [vmem:[#allocation5 + $0x348] sm:$0xff] }
  0x5d   :  { %2340 = vmatpush.bf16.msra.mxu1 %v3838_v24  ;;  %v115_v24 = vld [vmem:[#allocation2 + $0x30] sm:$0xff] }
  0x5e   :  { %2353 = vmatpush.bf16.msra.mxu2 %v3846_v25  ;;  %v3873_v25 = vld [vmem:[#allocation5 + $0x388] sm:$0xff] }
  0x5f   :  { %2366 = vmatpush.bf16.msra.mxu3 %v3854_v27  ;;  %v3881_v27 = vld [vmem:[#allocation5 + $0x3c8] sm:$0xff] }
  0x60   :  { %2328 = vmatpush.bf16.msra.mxu0 %v3829_v28  ;;  %v3856_v28 = vld [vmem:[#allocation5 + $0x300] sm:$0xff] }
  0x61   :  { %2341 = vmatpush.bf16.msra.mxu1 %v3837_v29  ;;  %v653_v29 = vunpack.c.l.b16 %v115_v24 }
  0x62   :  { %2354 = vmatpush.bf16.msra.mxu2 %v3845_v30  ;;  %v3864_v30 = vld [vmem:[#allocation5 + $0x340] sm:$0xff] }
  0x63   :  { %2367 = vmatpush.bf16.msra.mxu3 %v3853_v31  ;;  %v3895_v31 = vld [vmem:[#allocation5 + $0x438] sm:$0xff] }
  0x64   :  { %2329 = vmatpush.bf16.msra.mxu0 %v3828_v32  ;;  %v655_v32 = vunpack.c.l.b16 %v116_v26 }
  0x65   :  { %2342 = vmatpush.bf16.msra.mxu1 %v3836_v33  ;;  %v654_v33 = vunpack.c.h.b16 %v115_v24  ;;  %v3942_v24 = vld [vmem:[#allocation5 + $0x5b0] sm:$0xff] }
  0x66   :  { %2355 = vmatpush.bf16.msra.mxu2 %v3844_v34  ;;  %v3872_v34 = vld [vmem:[#allocation5 + $0x380] sm:$0xff] }
  0x67   :  { %2368 = vmatpush.bf16.msra.mxu3 %v3852_v35  ;;  %v3903_v35 = vld [vmem:[#allocation5 + $0x478] sm:$0xff] }
  0x68   :  { %2330 = vmatpush.bf16.msra.mxu0 %v3827_v36  ;;  %v656_v36 = vunpack.c.h.b16 %v116_v26  ;;  %v3925_v26 = vld [vmem:[#allocation5 + $0x528] sm:$0xff] }
  0x69   :  { %2343 = vmatpush.bf16.msra.mxu1 %v3835_v37  ;;  %v3911_v37 = vld [vmem:[#allocation5 + $0x4b8] sm:$0xff] }
  0x6a   :  { %2356 = vmatpush.bf16.msra.mxu2 %v3843_v38  ;;  %v3880_v38 = vld [vmem:[#allocation5 + $0x3c0] sm:$0xff] }
  0x6b   :  { %2369 = vmatpush.bf16.msra.mxu3 %v3851_v39  ;;  %v684_v39 = vpack.c.b16 %v653_v29, %v653_v29  ;;  %v4018_v29 = vld [vmem:[%s4269_s2] ss:$0 sm:$0xff] }
  0x6c   :  { %2331 = vmatpush.bf16.msra.mxu0 %v3826_v40  ;;  %v3919_v40 = vld [vmem:[#allocation5 + $0x4f8] sm:$0xff] }
  0x6d   :  { %2344 = vmatpush.bf16.msra.mxu1 %v3834_v41  ;;  %v686_v41 = vpack.c.b16 %v655_v32, %v655_v32 }
  0x6e   :  { %2357 = vmatpush.bf16.msra.mxu2 %v3842_v42  ;;  %v685_v42 = vpack.c.b16 %v654_v33, %v654_v33  ;;  %v3932_v33 = vld [vmem:[#allocation5 + $0x560] sm:$0xff] }
  0x6f   :  { %2370 = vmatpush.bf16.msra.mxu3 %v3850_v43  ;;  %v687_v43 = vpack.c.b16 %v656_v36, %v656_v36 }
  0x70   :  { %2332 = vmatpush.bf16.msra.mxu0 %v3825_v44  ;;  %v3894_v44 = vld [vmem:[#allocation5 + $0x430] sm:$0xff] }
  0x71   :  { %2345 = vmatpush.bf16.msra.mxu1 %v3833_v45  ;;  %v3902_v45 = vld [vmem:[#allocation5 + $0x470] sm:$0xff] }
  0x72   :  { %2358 = vmatpush.bf16.msra.mxu2 %v3841_v47  ;;  %v3918_v47 = vld [vmem:[#allocation5 + $0x4f0] sm:$0xff] }
  0x73   :  { %2371 = vmatpush.bf16.msra.mxu3 %v3849_v49  ;;  %v3901_v49 = vld [vmem:[#allocation5 + $0x468] sm:$0xff] }
  0x74   :  { %2333 = vmatpush.bf16.msra.mxu0 %v3824_v51  ;;  %v3917_v51 = vld [vmem:[#allocation5 + $0x4e8] sm:$0xff] }
  0x75   :  { %2346 = vmatpush.bf16.msra.mxu1 %v3832_v52  ;;  %v3892_v52 = vld [vmem:[#allocation5 + $0x420] sm:$0xff] }
  0x76   :  { %2359 = vmatpush.bf16.msra.mxu2 %v3840_v54  ;;  %v3908_v54 = vld [vmem:[#allocation5 + $0x4a0] sm:$0xff] }
  0x77   :  { %2372 = vmatpush.bf16.msra.mxu3 %v3848_v60  ;;  %2334 = vmatmul.bf16.vlgmr.msra.gmra.mxu0 %v680_v61  ;;  %v3890_v60 = vld [vmem:[#allocation5 + $0x410] sm:$0xff] }
  0x78   :  { %2378 = vmatpush.bf16.msrb.mxu0 %v3863_v55  ;;  %2347 = vmatmul.bf16.vlgmr.msra.gmra.mxu1 %v681_v0  ;;  %v3916_v55 = vld [vmem:[#allocation5 + $0x4e0] sm:$0xff]  ;;  %v3898_v61 = vld [vmem:[#allocation5 + $0x450] sm:$0xff]  ;;  %v3889_v0 = vld [vmem:[#allocation5 + $0x408] sm:$0xff] }
  0x79   :  { %2391 = vmatpush.bf16.msrb.mxu1 %v3871_v57  ;;  %2360 = vmatmul.bf16.vlgmr.msra.gmra.mxu2 %v682_v62  ;;  %v3899_v57 = vld [vmem:[#allocation5 + $0x458] sm:$0xff]  ;;  %v3906_v62 = vld [vmem:[#allocation5 + $0x490] sm:$0xff] }
  0x7a   :  { %2404 = vmatpush.bf16.msrb.mxu2 %v3879_v58  ;;  %2373 = vmatmul.bf16.vlgmr.msra.gmra.mxu3 %v683_v2  ;;  %v3907_v58 = vld [vmem:[#allocation5 + $0x498] sm:$0xff]  ;;  %v3905_v2 = vld [vmem:[#allocation5 + $0x488] sm:$0xff] }
  0x7b   :  { %2417 = vmatpush.bf16.msrb.mxu3 %v3887_v63  ;;  %v3914_v63 = vld [vmem:[#allocation5 + $0x4d0] sm:$0xff] }
  0x7c   :  { %2379 = vmatpush.bf16.msrb.mxu0 %v3862_v1  ;;  %v3897_v1 = vld [vmem:[#allocation5 + $0x448] sm:$0xff] }
  0x7d   :  { %2392 = vmatpush.bf16.msrb.mxu1 %v3870_v3  ;;  %v117_v3 = vld [vmem:[#allocation2 + $0x40] sm:$0xff] }
  0x7e   :  { %2405 = vmatpush.bf16.msrb.mxu2 %v3878_v4  ;;  %v118_v4 = vld [vmem:[#allocation2 + $0x48] sm:$0xff] }
  0x7f   :  { %2418 = vmatpush.bf16.msrb.mxu3 %v3886_v5  ;;  %v3913_v5 = vld [vmem:[#allocation5 + $0x4c8] sm:$0xff] }
  0x80   :  { %2380 = vmatpush.bf16.msrb.mxu0 %v3861_v6  ;;  %v3888_v6 = vld [vmem:[#allocation5 + $0x400] sm:$0xff] }
  0x81   :  { %2393 = vmatpush.bf16.msrb.mxu1 %v3869_v7  ;;  %v657_v7 = vunpack.c.l.b16 %v117_v3 }
  0x82   :  { %2406 = vmatpush.bf16.msrb.mxu2 %v3877_v8  ;;  %v659_v8 = vunpack.c.l.b16 %v118_v4 }
  0x83   :  { %2419 = vmatpush.bf16.msrb.mxu3 %v3885_v9  ;;  %v3896_v9 = vld [vmem:[#allocation5 + $0x440] sm:$0xff] }
  0x84   :  { %2381 = vmatpush.bf16.msrb.mxu0 %v3860_v10  ;;  %v3904_v10 = vld [vmem:[#allocation5 + $0x480] sm:$0xff] }
  0x85   :  { %2394 = vmatpush.bf16.msrb.mxu1 %v3868_v11  ;;  %v658_v11 = vunpack.c.h.b16 %v117_v3  ;;  %v3967_v3 = vld [vmem:[#allocation5 + $0x678] sm:$0xff] }
  0x86   :  { %2407 = vmatpush.bf16.msrb.mxu2 %v3876_v12  ;;  %v3927_v12 = vld [vmem:[#allocation5 + $0x538] sm:$0xff] }
  0x87   :  { %2420 = vmatpush.bf16.msrb.mxu3 %v3884_v13  ;;  %v3935_v13 = vld [vmem:[#allocation5 + $0x578] sm:$0xff] }
  0x88   :  { %2382 = vmatpush.bf16.msrb.mxu0 %v3859_v14  ;;  %v660_v14 = vunpack.c.h.b16 %v118_v4 }
  0x89   :  { %2395 = vmatpush.bf16.msrb.mxu1 %v3867_v15  ;;  %v3943_v15 = vld [vmem:[#allocation5 + $0x5b8] sm:$0xff] }
  0x8a   :  { %2408 = vmatpush.bf16.msrb.mxu2 %v3875_v16  ;;  %v3912_v16 = vld [vmem:[#allocation5 + $0x4c0] sm:$0xff] }
  0x8b   :  { %2421 = vmatpush.bf16.msrb.mxu3 %v3883_v17  ;;  %v688_v17 = vpack.c.b16 %v657_v7, %v657_v7  ;;  %v3944_v7 = vld [vmem:[#allocation5 + $0x5c0] sm:$0xff] }
  0x8c   :  { %2383 = vmatpush.bf16.msrb.mxu0 %v3858_v18  ;;  %v690_v18 = vpack.c.b16 %v659_v8, %v659_v8 }
  0x8d   :  { %2396 = vmatpush.bf16.msrb.mxu1 %v3866_v19  ;;  %v3951_v19 = vld [vmem:[#allocation5 + $0x5f8] sm:$0xff] }
  0x8e   :  { %2409 = vmatpush.bf16.msrb.mxu2 %v3874_v20  ;;  %v689_v20 = vpack.c.b16 %v658_v11, %v658_v11 }
  0x8f   :  { %2422 = vmatpush.bf16.msrb.mxu3 %v3882_v21  ;;  %v691_v21 = vpack.c.b16 %v660_v14, %v660_v14  ;;  %v3966_v14 = vld [vmem:[#allocation5 + $0x670] sm:$0xff] }
  0x90   :  { %2384 = vmatpush.bf16.msrb.mxu0 %v3857_v22  ;;  %v3926_v22 = vld [vmem:[#allocation5 + $0x530] sm:$0xff] }
  0x91   :  { %2397 = vmatpush.bf16.msrb.mxu1 %v3865_v23  ;;  %v3934_v23 = vld [vmem:[#allocation5 + $0x570] sm:$0xff] }
  0x92   :  { %2410 = vmatpush.bf16.msrb.mxu2 %v3873_v25  ;;  %v3950_v25 = vld [vmem:[#allocation5 + $0x5f0] sm:$0xff] }
  0x93   :  { %2423 = vmatpush.bf16.msrb.mxu3 %v3881_v27  ;;  %v3933_v27 = vld [vmem:[#allocation5 + $0x568] sm:$0xff] }
  0x94   :  { %2385 = vmatpush.bf16.msrb.mxu0 %v3856_v28  ;;  %v3941_v28 = vld [vmem:[#allocation5 + $0x5a8] sm:$0xff] }
  0x95   :  { %2398 = vmatpush.bf16.msrb.mxu1 %v3864_v30  ;;  %v3949_v30 = vld [vmem:[#allocation5 + $0x5e8] sm:$0xff] }
  0x96   :  { %2411 = vmatpush.bf16.msrb.mxu2 %v3872_v34  ;;  %v3940_v34 = vld [vmem:[#allocation5 + $0x5a0] sm:$0xff] }
  0x97   :  { %2424 = vmatpush.bf16.msrb.mxu3 %v3880_v38  ;;  %2386 = vmatmul.bf16.vlgmr.msrb.gmra.mxu0 %v684_v39  ;;  %v3923_v39 = vld [vmem:[#allocation5 + $0x518] sm:$0xff] }
  0x98   :  { %2430 = vmatpush.bf16.msra.mxu0 %v3895_v31  ;;  %2399 = vmatmul.bf16.vlgmr.msrb.gmra.mxu1 %v685_v42  ;;  %v3924_v31 = vld [vmem:[#allocation5 + $0x520] sm:$0xff]  ;;  %v3947_v42 = vld [vmem:[#allocation5 + $0x5d8] sm:$0xff] }
  0x99   :  { %2443 = vmatpush.bf16.msra.mxu1 %v3903_v35  ;;  %2412 = vmatmul.bf16.vlgmr.msrb.gmra.mxu2 %v686_v41  ;;  %v3939_v41 = vld [vmem:[#allocation5 + $0x598] sm:$0xff] }
  0x9a   :  { %2456 = vmatpush.bf16.msra.mxu2 %v3911_v37  ;;  %2425 = vmatmul.bf16.vlgmr.msrb.gmra.mxu3 %v687_v43  ;;  %v3948_v37 = vld [vmem:[#allocation5 + $0x5e0] sm:$0xff] }
  0x9b   :  { %2469 = vmatpush.bf16.msra.mxu3 %v3919_v40  ;;  %v3931_v40 = vld [vmem:[#allocation5 + $0x558] sm:$0xff] }
  0x9c   :  { %2431 = vmatpush.bf16.msra.mxu0 %v3894_v44  ;;  %v3922_v44 = vld [vmem:[#allocation5 + $0x510] sm:$0xff] }
  0x9d   :  { %2444 = vmatpush.bf16.msra.mxu1 %v3902_v45 }
  0x9e   :  { %2457 = vmatpush.bf16.msra.mxu2 %v3910_v46 }
  0x9f   :  { %2470 = vmatpush.bf16.msra.mxu3 %v3918_v47  ;;  %v3930_v47 = vld [vmem:[#allocation5 + $0x550] sm:$0xff] }
  0xa0   :  { %2432 = vmatpush.bf16.msra.mxu0 %v3893_v48  ;;  %v3938_v48 = vld [vmem:[#allocation5 + $0x590] sm:$0xff] }
  0xa1   :  { %2445 = vmatpush.bf16.msra.mxu1 %v3901_v49 }
  0xa2   :  { %2458 = vmatpush.bf16.msra.mxu2 %v3909_v50 }
  0xa3   :  { %2471 = vmatpush.bf16.msra.mxu3 %v3917_v51  ;;  %v3946_v51 = vld [vmem:[#allocation5 + $0x5d0] sm:$0xff] }
  0xa4   :  { %2433 = vmatpush.bf16.msra.mxu0 %v3892_v52 }
  0xa5   :  { %2446 = vmatpush.bf16.msra.mxu1 %v3900_v53  ;;  %v3921_v53 = vld [vmem:[#allocation5 + $0x508] sm:$0xff] }
  0xa6   :  { %2459 = vmatpush.bf16.msra.mxu2 %v3908_v54  ;;  %v3929_v54 = vld [vmem:[#allocation5 + $0x548] sm:$0xff] }
  0xa7   :  { %2472 = vmatpush.bf16.msra.mxu3 %v3916_v55  ;;  %v3937_v55 = vld [vmem:[#allocation5 + $0x588] sm:$0xff] }
  0xa8   :  { %2434 = vmatpush.bf16.msra.mxu0 %v3891_v56  ;;  %v119_v56 = vld [vmem:[#allocation2 + $0x50] sm:$0xff] }
  0xa9   :  { %2447 = vmatpush.bf16.msra.mxu1 %v3899_v57  ;;  %v120_v57 = vld [vmem:[#allocation2 + $0x58] sm:$0xff] }
  0xaa   :  { %2460 = vmatpush.bf16.msra.mxu2 %v3907_v58  ;;  %v3945_v58 = vld [vmem:[#allocation5 + $0x5c8] sm:$0xff]  ;;  %v664_v4 = vunpack.c.h.b16 %v120_v57 }
  0xab   :  { %2473 = vmatpush.bf16.msra.mxu3 %v3915_v59 }
  0xac   :  { %2435 = vmatpush.bf16.msra.mxu0 %v3890_v60  ;;  %v3920_v60 = vld [vmem:[#allocation5 + $0x500] sm:$0xff] }
  0xad   :  { %2448 = vmatpush.bf16.msra.mxu1 %v3898_v61  ;;  %v661_v61 = vunpack.c.l.b16 %v119_v56 }
  0xae   :  { %2461 = vmatpush.bf16.msra.mxu2 %v3906_v62  ;;  %v663_v62 = vunpack.c.l.b16 %v120_v57  ;;  %v3991_v57 = vld [vmem:[#allocation5 + $0x738] sm:$0xff] }
  0xaf   :  { %2474 = vmatpush.bf16.msra.mxu3 %v3914_v63  ;;  %v3928_v63 = vld [vmem:[#allocation5 + $0x540] sm:$0xff]  ;;  %v692_v8 = vpack.c.b16 %v661_v61, %v661_v61 }
  0xb0   :  { %2436 = vmatpush.bf16.msra.mxu0 %v3889_v0  ;;  %v3936_v0 = vld [vmem:[#allocation5 + $0x580] sm:$0xff] }
  0xb1   :  { %2449 = vmatpush.bf16.msra.mxu1 %v3897_v1  ;;  %v662_v1 = vunpack.c.h.b16 %v119_v56  ;;  %v3976_v61 = vld [vmem:[#allocation5 + $0x6c0] sm:$0xff] }
  0xb2   :  { %2462 = vmatpush.bf16.msra.mxu2 %v3905_v2  ;;  %v3959_v2 = vld [vmem:[#allocation5 + $0x638] sm:$0xff] }
  0xb3   :  { %2475 = vmatpush.bf16.msra.mxu3 %v3913_v5  ;;  %v693_v11 = vpack.c.b16 %v662_v1, %v662_v1 }
  0xb4   :  { %2437 = vmatpush.bf16.msra.mxu0 %v3888_v6  ;;  %v2231_v32 = vpop.f32.mrf.mxu0  ;;  %v3975_v6 = vld [vmem:[#allocation5 + $0x6b8] sm:$0xff] }
  0xb5   :  { %2450 = vmatpush.bf16.msra.mxu1 %v3896_v9  ;;  %v2232_v35 = vadd.f32 %v4018_v29, %v2231_v32  ;;  %v2244_v36 = vpop.f32.mrf.mxu1  ;;  %v694_v9 = vpack.c.b16 %v663_v62, %v663_v62 }
  0xb6   :  { %2463 = vmatpush.bf16.msra.mxu2 %v3904_v10  ;;  %v3983_v10 = vld [vmem:[#allocation5 + $0x6f8] sm:$0xff] }
  0xb7   :  { %2476 = vmatpush.bf16.msra.mxu3 %v3912_v16  ;;  %2438 = vmatmul.bf16.vlgmr.msra.gmra.mxu0 %v688_v17  ;;  %v2245_v38 = vadd.f32 %v2244_v36, %v2232_v35  ;;  %v3982_v16 = vld [vmem:[#allocation5 + $0x6f0] sm:$0xff]  ;;  %v3957_v17 = vld [vmem:[#allocation5 + $0x628] sm:$0xff] }
  0xb8   :  { %2482 = vmatpush.bf16.msrb.mxu0 %v3927_v12  ;;  %2451 = vmatmul.bf16.vlgmr.msra.gmra.mxu1 %v689_v20  ;;  %v695_v12 = vpack.c.b16 %v664_v4, %v664_v4  ;;  %v3981_v20 = vld [vmem:[#allocation5 + $0x6e8] sm:$0xff]  ;;  %v3954_v35 = vld [vmem:[#allocation5 + $0x610] sm:$0xff] }
  0xb9   :  { %2495 = vmatpush.bf16.msrb.mxu1 %v3935_v13  ;;  %2464 = vmatmul.bf16.vlgmr.msra.gmra.mxu2 %v690_v18  ;;  %v3958_v13 = vld [vmem:[#allocation5 + $0x630] sm:$0xff]  ;;  %v3965_v18 = vld [vmem:[#allocation5 + $0x668] sm:$0xff] }
  0xba   :  { %2508 = vmatpush.bf16.msrb.mxu2 %v3943_v15  ;;  %2477 = vmatmul.bf16.vlgmr.msra.gmra.mxu3 %v691_v21  ;;  %v3974_v15 = vld [vmem:[#allocation5 + $0x6b0] sm:$0xff]  ;;  %v3956_v21 = vld [vmem:[#allocation5 + $0x620] sm:$0xff] }
  0xbb   :  { %2521 = vmatpush.bf16.msrb.mxu3 %v3951_v19  ;;  %v3973_v19 = vld [vmem:[#allocation5 + $0x6a8] sm:$0xff]  ;;  %v3962_v36 = vld [vmem:[#allocation5 + $0x650] sm:$0xff] }
  0xbc   :  { %2483 = vmatpush.bf16.msrb.mxu0 %v3926_v22  ;;  %v2257_v43 = vpop.f32.mrf.mxu2  ;;  %v2233_v46 = vpop.f32.mrf.mxu0  ;;  %v3964_v22 = vld [vmem:[#allocation5 + $0x660] sm:$0xff]  ;;  %v4006_v4 = vld [vmem:[#allocation5 + $0x7b0] sm:$0xff] }
  0xbd   :  { %2496 = vmatpush.bf16.msrb.mxu1 %v3934_v23  ;;  %v2258_v45 = vadd.f32 %v2257_v43, %v2245_v38  ;;  %v2270_v49 = vpop.f32.mrf.mxu3  ;;  %v2246_v50 = vpop.f32.mrf.mxu1  ;;  %v3972_v23 = vld [vmem:[#allocation5 + $0x6a0] sm:$0xff]  ;;  %v3953_v43 = vld [vmem:[#allocation5 + $0x608] sm:$0xff] }
  0xbe   :  { %2509 = vmatpush.bf16.msrb.mxu2 %v3942_v24  ;;  %v121_v46 = vld [vmem:[#allocation2 + $0x60] sm:$0xff] }
  0xbf   :  { %2522 = vmatpush.bf16.msrb.mxu3 %v3950_v25  ;;  %v4252_v52 = vadd.f32 %v2270_v49, %v2258_v45  ;;  %v3969_v45 = vld [vmem:[#allocation5 + $0x688] sm:$0xff]  ;;  %v3952_v50 = vld [vmem:[#allocation5 + $0x600] sm:$0xff] }
  0xc0   :  { %2484 = vmatpush.bf16.msrb.mxu0 %v3925_v26  ;;  %v3977_v49 = vld [vmem:[#allocation5 + $0x6c8] sm:$0xff] }
  0xc1   :  { %2497 = vmatpush.bf16.msrb.mxu1 %v3933_v27  ;;  %v3980_v27 = vld [vmem:[#allocation5 + $0x6e0] sm:$0xff] }
  0xc2   :  { %2510 = vmatpush.bf16.msrb.mxu2 %v3941_v28  ;;  %v3955_v28 = vld [vmem:[#allocation5 + $0x618] sm:$0xff] }
  0xc3   :  { %2523 = vmatpush.bf16.msrb.mxu3 %v3949_v30  ;;  %v3963_v30 = vld [vmem:[#allocation5 + $0x658] sm:$0xff] }
  0xc4   :  { %2485 = vmatpush.bf16.msrb.mxu0 %v3924_v31  ;;  %v2259_v59 = vpop.f32.mrf.mxu2  ;;  %v3971_v31 = vld [vmem:[#allocation5 + $0x698] sm:$0xff] }
  0xc5   :  { %2498 = vmatpush.bf16.msrb.mxu1 %v3932_v33  ;;  %v2272_v5 = vpop.f32.mrf.mxu3  ;;  %v3979_v33 = vld [vmem:[#allocation5 + $0x6d8] sm:$0xff] }
  0xc6   :  { %2511 = vmatpush.bf16.msrb.mxu2 %v3940_v34  ;;  %v3989_v5 = vld [vmem:[#allocation5 + $0x728] sm:$0xff] }
  0xc7   :  { %2524 = vmatpush.bf16.msrb.mxu3 %v3948_v37  ;;  %v3970_v37 = vld [vmem:[#allocation5 + $0x690] sm:$0xff] }
  0xc8   :  { %2486 = vmatpush.bf16.msrb.mxu0 %v3923_v39 }
  0xc9   :  { %2499 = vmatpush.bf16.msrb.mxu1 %v3931_v40 }
  0xca   :  { %2512 = vmatpush.bf16.msrb.mxu2 %v3939_v41 }
  0xcb   :  { %2525 = vmatpush.bf16.msrb.mxu3 %v3947_v42  ;;  %v3978_v42 = vld [vmem:[#allocation5 + $0x6d0] sm:$0xff] }
  0xcc   :  { %2487 = vmatpush.bf16.msrb.mxu0 %v3922_v44  ;;  %v3961_v44 = vld [vmem:[#allocation5 + $0x648] sm:$0xff] }
  0xcd   :  { %2500 = vmatpush.bf16.msrb.mxu1 %v3930_v47  ;;  %v122_v47 = vld [vmem:[#allocation2 + $0x68] sm:$0xff] }
  0xce   :  { %2513 = vmatpush.bf16.msrb.mxu2 %v3938_v48  ;;  %v668_v59 = vunpack.c.h.b16 %v122_v47 }
  0xcf   :  { %2526 = vmatpush.bf16.msrb.mxu3 %v3946_v51  ;;  %v665_v51 = vunpack.c.l.b16 %v121_v46 }
  0xd0   :  { %2488 = vmatpush.bf16.msrb.mxu0 %v3921_v53  ;;  %v3960_v53 = vld [vmem:[#allocation5 + $0x640] sm:$0xff]  ;;  %v699_v1 = vpack.c.b16 %v668_v59, %v668_v59 }
  0xd1   :  { %2501 = vmatpush.bf16.msrb.mxu1 %v3929_v54  ;;  %v3968_v54 = vld [vmem:[#allocation5 + $0x680] sm:$0xff]  ;;  %v696_v62 = vpack.c.b16 %v665_v51, %v665_v51 }
  0xd2   :  { %2514 = vmatpush.bf16.msrb.mxu2 %v3937_v55  ;;  %v666_v55 = vunpack.c.h.b16 %v121_v46 }
  0xd3   :  { %2527 = vmatpush.bf16.msrb.mxu3 %v3945_v58  ;;  %v3999_v58 = vld [vmem:[#allocation5 + $0x778] sm:$0xff] }
  0xd4   :  { %2489 = vmatpush.bf16.msrb.mxu0 %v3920_v60  ;;  %v2283_v24 = vpop.f32.mrf.mxu0  ;;  %v4007_v60 = vld [vmem:[#allocation5 + $0x7b8] sm:$0xff] }
  0xd5   :  { %2502 = vmatpush.bf16.msrb.mxu1 %v3928_v63  ;;  %v2296_v25 = vpop.f32.mrf.mxu1  ;;  %v2284_v26 = vadd.f32 %v2283_v24, %v4252_v52  ;;  %v667_v52 = vunpack.c.l.b16 %v122_v47  ;;  %v3994_v24 = vld [vmem:[#allocation5 + $0x750] sm:$0xff] }
  0xd6   :  { %2515 = vmatpush.bf16.msrb.mxu2 %v3936_v0  ;;  %v697_v0 = vpack.c.b16 %v666_v55, %v666_v55 }
  0xd7   :  { %2528 = vmatpush.bf16.msrb.mxu3 %v3944_v7  ;;  %2490 = vmatmul.bf16.vlgmr.msrb.gmra.mxu0 %v692_v8  ;;  %v2297_v29 = vadd.f32 %v2296_v25, %v2284_v26  ;;  %v698_v63 = vpack.c.b16 %v667_v52, %v667_v52  ;;  %v4005_v7 = vld [vmem:[#allocation5 + $0x7a8] sm:$0xff]  ;;  %v4002_v25 = vld [vmem:[#allocation5 + $0x790] sm:$0xff] }
  0xd8   :  { %2534 = vmatpush.bf16.msra.mxu0 %v3959_v2  ;;  %2503 = vmatmul.bf16.vlgmr.msrb.gmra.mxu1 %v693_v11  ;;  %v3990_v2 = vld [vmem:[#allocation5 + $0x730] sm:$0xff]  ;;  %v3996_v11 = vld [vmem:[#allocation5 + $0x760] sm:$0xff] }
  0xd9   :  { %2547 = vmatpush.bf16.msra.mxu1 %v3967_v3  ;;  %2516 = vmatmul.bf16.vlgmr.msrb.gmra.mxu2 %v694_v9  ;;  %v3998_v3 = vld [vmem:[#allocation5 + $0x770] sm:$0xff] }
  0xda   :  { %2560 = vmatpush.bf16.msra.mxu2 %v3975_v6  ;;  %2529 = vmatmul.bf16.vlgmr.msrb.gmra.mxu3 %v695_v12  ;;  %v3997_v6 = vld [vmem:[#allocation5 + $0x768] sm:$0xff]  ;;  %v4004_v12 = vld [vmem:[#allocation5 + $0x7a0] sm:$0xff] }
  0xdb   :  { %2573 = vmatpush.bf16.msra.mxu3 %v3983_v10  ;;  %v3988_v10 = vld [vmem:[#allocation5 + $0x720] sm:$0xff] }
  0xdc   :  { %2535 = vmatpush.bf16.msra.mxu0 %v3958_v13  ;;  %v2309_v32 = vpop.f32.mrf.mxu2  ;;  %v2285_v39 = vpop.f32.mrf.mxu0 }
  0xdd   :  { %2548 = vmatpush.bf16.msra.mxu1 %v3966_v14  ;;  %v2310_v34 = vadd.f32 %v2309_v32, %v2297_v29  ;;  %v2322_v38 = vpop.f32.mrf.mxu3  ;;  %v2298_v41 = vpop.f32.mrf.mxu1  ;;  %v3993_v29 = vld [vmem:[#allocation5 + $0x748] sm:$0xff]  ;;  %v4000_v39 = vld [vmem:[#allocation5 + $0x780] sm:$0xff] }
  0xde   :  { %2561 = vmatpush.bf16.msra.mxu2 %v3974_v15  ;;  %v3987_v15 = vld [vmem:[#allocation5 + $0x718] sm:$0xff] }
  0xdf   :  { %2574 = vmatpush.bf16.msra.mxu3 %v3982_v16  ;;  %v2323_v40 = vadd.f32 %v2322_v38, %v2310_v34  ;;  %v3995_v16 = vld [vmem:[#allocation5 + $0x758] sm:$0xff]  ;;  %v3984_v34 = vld [vmem:[#allocation5 + $0x700] sm:$0xff] }
  0xe0   :  { %2536 = vmatpush.bf16.msra.mxu0 %v3957_v17  ;;  %v4003_v17 = vld [vmem:[#allocation5 + $0x798] sm:$0xff]  ;;  %v3992_v38 = vld [vmem:[#allocation5 + $0x740] sm:$0xff] }
  0xe1   :  { %2549 = vmatpush.bf16.msra.mxu1 %v3965_v18 }
  0xe2   :  { %2562 = vmatpush.bf16.msra.mxu2 %v3973_v19 }
  0xe3   :  { %2575 = vmatpush.bf16.msra.mxu3 %v3981_v20 }
  0xe4   :  { %2537 = vmatpush.bf16.msra.mxu0 %v3956_v21  ;;  %v2311_v48 = vpop.f32.mrf.mxu2 }
  0xe5   :  { %2550 = vmatpush.bf16.msra.mxu1 %v3964_v22  ;;  %v2324_v56 = vpop.f32.mrf.mxu3  ;;  %v3986_v22 = vld [vmem:[#allocation5 + $0x710] sm:$0xff] }
  0xe6   :  { %2563 = vmatpush.bf16.msra.mxu2 %v3972_v23 }
  0xe7   :  { %2576 = vmatpush.bf16.msra.mxu3 %v3980_v27  ;;  %v3985_v27 = vld [vmem:[#allocation5 + $0x708] sm:$0xff] }
  0xe8   :  { %2538 = vmatpush.bf16.msra.mxu0 %v3955_v28  ;;  %v123_v28 = vld [vmem:[#allocation2 + $0x70] sm:$0xff] }
  0xe9   :  { %2551 = vmatpush.bf16.msra.mxu1 %v3963_v30  ;;  %v4001_v30 = vld [vmem:[#allocation5 + $0x788] sm:$0xff] }
  0xea   :  { %2564 = vmatpush.bf16.msra.mxu2 %v3971_v31  ;;  %v124_v31 = vld [vmem:[#allocation2 + $0x78] sm:$0xf] }
  0xeb   :  { %2577 = vmatpush.bf16.msra.mxu3 %v3979_v33  ;;  %v669_v33 = vunpack.c.l.b16 %v123_v28 }
  0xec   :  { %2539 = vmatpush.bf16.msra.mxu0 %v3954_v35  ;;  %v670_v35 = vunpack.c.h.b16 %v123_v28 }
  0xed   :  { %2552 = vmatpush.bf16.msra.mxu1 %v3962_v36  ;;  %v671_v36 = vunpack.c.l.b16 %v124_v31 }
  0xee   :  { %2565 = vmatpush.bf16.msra.mxu2 %v3970_v37  ;;  %v701_v41 = vpack.c.b16 %v670_v35, %v670_v35  ;;  %v2682_v35 = vld [vmem:[#allocation8 + $0x78] sm:$0xff] }
  0xef   :  { %2578 = vmatpush.bf16.msra.mxu3 %v3978_v42  ;;  %v702_v42 = vpack.c.b16 %v671_v36, %v671_v36  ;;  %v2681_v36 = vld [vmem:[#allocation8 + $0x70] sm:$0xff] }
  0xf0   :  { %2540 = vmatpush.bf16.msra.mxu0 %v3953_v43 }
  0xf1   :  { %2553 = vmatpush.bf16.msra.mxu1 %v3961_v44 }
  0xf2   :  { %2566 = vmatpush.bf16.msra.mxu2 %v3969_v45 }
  0xf3   :  { %2579 = vmatpush.bf16.msra.mxu3 %v3977_v49 }
  0xf4   :  { %2541 = vmatpush.bf16.msra.mxu0 %v3952_v50  ;;  %v2335_v8 = vpop.f32.mrf.mxu0 }
  0xf5   :  { %2554 = vmatpush.bf16.msra.mxu1 %v3960_v53  ;;  %v2336_v9 = vadd.f32 %v2335_v8, %v2323_v40  ;;  %v2348_v13 = vpop.f32.mrf.mxu1  ;;  %v700_v40 = vpack.c.b16 %v669_v33, %v669_v33 }
  0xf6   :  { %2567 = vmatpush.bf16.msra.mxu2 %v3968_v54 }
  0xf7   :  { %2580 = vmatpush.bf16.msra.mxu3 %v3976_v61  ;;  %2542 = vmatmul.bf16.vlgmr.msra.gmra.mxu0 %v696_v62  ;;  %v2349_v14 = vadd.f32 %v2348_v13, %v2336_v9  ;;  %v2637_v13 = vld [vmem:[#allocation7 + $0x58] sm:$0xff] }
  0xf8   :  { %2586 = vmatpush.bf16.msrb.mxu0 %v3991_v57  ;;  %2555 = vmatmul.bf16.vlgmr.msra.gmra.mxu1 %v697_v0 }
  0xf9   :  { %2599 = vmatpush.bf16.msrb.mxu1 %v3999_v58  ;;  %2568 = vmatmul.bf16.vlgmr.msra.gmra.mxu2 %v698_v63 }
  0xfa   :  { %2612 = vmatpush.bf16.msrb.mxu2 %v4007_v60  ;;  %2581 = vmatmul.bf16.vlgmr.msra.gmra.mxu3 %v699_v1 }
  0xfc   :  { %2587 = vmatpush.bf16.msrb.mxu0 %v3990_v2  ;;  %v2361_v18 = vpop.f32.mrf.mxu2  ;;  %v2337_v20 = vpop.f32.mrf.mxu0 }
  0xfd   :  { %2600 = vmatpush.bf16.msrb.mxu1 %v3998_v3  ;;  %v2362_v19 = vadd.f32 %v2361_v18, %v2349_v14  ;;  %v2374_v21 = vpop.f32.mrf.mxu3  ;;  %v2350_v26 = vpop.f32.mrf.mxu1  ;;  %v2634_v18 = vld [vmem:[#allocation7 + $0x40] sm:$0xff]  ;;  %v2632_v20 = vld [vmem:[#allocation7 + $0x30] sm:$0xff] }
  0xfe   :  { %2613 = vmatpush.bf16.msrb.mxu2 %v4006_v4  ;;  %v2628_v26 = vld [vmem:[#allocation7 + $0x10] sm:$0xff] }
  0xff   :  { %v2375_v23 = vadd.f32 %v2374_v21, %v2362_v19  ;;  %v2633_v19 = vld [vmem:[#allocation7 + $0x38] sm:$0xff]  ;;  %v2631_v21 = vld [vmem:[#allocation7 + $0x28] sm:$0xff] }
 0x100   :  { %2588 = vmatpush.bf16.msrb.mxu0 %v3989_v5 }
 0x101   :  { %2601 = vmatpush.bf16.msrb.mxu1 %v3997_v6  ;;  %v2641_v6 = vld [vmem:[#allocation7 + $0x78] sm:$0xff] }
 0x102   :  { %2614 = vmatpush.bf16.msrb.mxu2 %v4005_v7  ;;  %v2640_v7 = vld [vmem:[#allocation7 + $0x70] sm:$0xff]  ;;  %2646 = vmatpush.msrb.mxu3 %v2641_v6 }
 0x103   :  { %v2722_v6 = vld [vmem:[#allocation10 + $0x70] sm:$0xff] }
 0x104   :  { %2589 = vmatpush.bf16.msrb.mxu0 %v3988_v10  ;;  %v2363_v32 = vpop.f32.mrf.mxu2  ;;  %2647 = vmatpush.msrb.mxu3 %v2640_v7  ;;  %v2721_v7 = vld [vmem:[#allocation10 + $0x68] sm:$0xff] }
 0x105   :  { %2602 = vmatpush.bf16.msrb.mxu1 %v3996_v11  ;;  %v2376_v37 = vpop.f32.mrf.mxu3  ;;  %v2639_v11 = vld [vmem:[#allocation7 + $0x68] sm:$0xff] }
 0x106   :  { %2615 = vmatpush.bf16.msrb.mxu2 %v4004_v12  ;;  %v2638_v12 = vld [vmem:[#allocation7 + $0x60] sm:$0xff]  ;;  %2648 = vmatpush.msrb.mxu3 %v2639_v11  ;;  %v2717_v11 = vld [vmem:[#allocation10 + $0x48] sm:$0xff] }
 0x108   :  { %2590 = vmatpush.bf16.msrb.mxu0 %v3987_v15  ;;  %2649 = vmatpush.msrb.mxu3 %v2638_v12  ;;  %v2636_v15 = vld [vmem:[#allocation7 + $0x50] sm:$0xff]  ;;  %v2716_v12 = vld [vmem:[#allocation10 + $0x40] sm:$0xff] }
 0x109   :  { %2603 = vmatpush.bf16.msrb.mxu1 %v3995_v16 }
 0x10a   :  { %2616 = vmatpush.bf16.msrb.mxu2 %v4003_v17  ;;  %2650 = vmatpush.msrb.mxu3 %v2637_v13  ;;  %v2635_v17 = vld [vmem:[#allocation7 + $0x48] sm:$0xff]  ;;  %v2715_v13 = vld [vmem:[#allocation10 + $0x38] sm:$0xff] }
 0x10c   :  { %2591 = vmatpush.bf16.msrb.mxu0 %v3986_v22  ;;  %2651 = vmatpush.msrb.mxu3 %v2636_v15  ;;  %v2630_v22 = vld [vmem:[#allocation7 + $0x20] sm:$0xff]  ;;  %v2713_v15 = vld [vmem:[#allocation10 + $0x28] sm:$0xff] }
 0x10d   :  { %2604 = vmatpush.bf16.msrb.mxu1 %v3994_v24  ;;  %v2629_v24 = vld [vmem:[#allocation7 + $0x18] sm:$0xff] }
 0x10e   :  { %2617 = vmatpush.bf16.msrb.mxu2 %v4002_v25  ;;  %2652 = vmatpush.msrb.mxu3 %v2635_v17  ;;  %v2711_v17 = vld [vmem:[#allocation10 + $0x18] sm:$0xff] }
 0x110   :  { %2592 = vmatpush.bf16.msrb.mxu0 %v3985_v27  ;;  %2653 = vmatpush.msrb.mxu3 %v2634_v18  ;;  %v2627_v27 = vld [vmem:[#allocation7 + $0x8] sm:$0xff]  ;;  %v4019_v18 = vld [vmem:[%s4271_s4] ss:$0 sm:$0xff] }
 0x111   :  { %2605 = vmatpush.bf16.msrb.mxu1 %v3993_v29 }
 0x112   :  { %2618 = vmatpush.bf16.msrb.mxu2 %v4001_v30  ;;  %2654 = vmatpush.msrb.mxu3 %v2633_v19  ;;  %v2626_v30 = vld [vmem:[#allocation7] sm:$0xff] }
 0x114   :  { %2593 = vmatpush.bf16.msrb.mxu0 %v3984_v34  ;;  %v2387_v43 = vpop.f32.mrf.mxu0  ;;  %2655 = vmatpush.msrb.mxu3 %v2632_v20 }
 0x115   :  { %2606 = vmatpush.bf16.msrb.mxu1 %v3992_v38  ;;  %v2388_v44 = vadd.f32 %v2387_v43, %v2375_v23  ;;  %v2400_v45 = vpop.f32.mrf.mxu1  ;;  %v2678_v43 = vld [vmem:[#allocation8 + $0x58] sm:$0xff] }
 0x116   :  { %2619 = vmatpush.bf16.msrb.mxu2 %v4000_v39  ;;  %2656 = vmatpush.msrb.mxu3 %v2631_v21  ;;  %v2680_v39 = vld [vmem:[#allocation8 + $0x68] sm:$0xff] }
 0x117   :  { %2594 = vmatmul.bf16.vlgmr.msrb.gmra.mxu0 %v700_v40  ;;  %v2401_v46 = vadd.f32 %v2400_v45, %v2388_v44  ;;  %v2677_v45 = vld [vmem:[#allocation8 + $0x50] sm:$0xff] }
 0x118   :  { %2607 = vmatmul.bf16.vlgmr.msrb.gmra.mxu1 %v701_v41  ;;  %2657 = vmatpush.msrb.mxu3 %v2630_v22  ;;  %v2679_v41 = vld [vmem:[#allocation8 + $0x60] sm:$0xff]  ;;  %v2710_v22 = vld [vmem:[#allocation10 + $0x10] sm:$0xff] }
 0x119   :  { %2620 = vmatmul.bf16.vlgmr.msrb.gmra.mxu2 %v702_v42  ;;  %2687 = vmatpush.msra.mxu0 %v2682_v35 }
 0x11a   :  { %2658 = vmatpush.msrb.mxu3 %v2629_v24  ;;  %v2708_v24 = vld [vmem:[#allocation10] sm:$0xff] }
 0x11b   :  { %2688 = vmatpush.msra.mxu0 %v2681_v36 }
 0x11c   :  { %v2413_v47 = vpop.f32.mrf.mxu2  ;;  %v2389_v50 = vpop.f32.mrf.mxu0  ;;  %2659 = vmatpush.msrb.mxu3 %v2628_v26 }
 0x11d   :  { %v2414_v48 = vadd.f32 %v2413_v47, %v2401_v46  ;;  %v2426_v49 = vpop.f32.mrf.mxu3  ;;  %v2402_v51 = vpop.f32.mrf.mxu1  ;;  %2689 = vmatpush.msra.mxu0 %v2680_v39  ;;  %v2676_v46 = vld [vmem:[#allocation8 + $0x48] sm:$0xff]  ;;  %v2674_v50 = vld [vmem:[#allocation8 + $0x38] sm:$0xff] }
 0x11e   :  { %2660 = vmatpush.msrb.mxu3 %v2627_v27  ;;  %v2673_v51 = vld [vmem:[#allocation8 + $0x30] sm:$0xff] }
 0x11f   :  { %v2427_v52 = vadd.f32 %v2426_v49, %v2414_v48  ;;  %2690 = vmatpush.msra.mxu0 %v2679_v41  ;;  %v2675_v48 = vld [vmem:[#allocation8 + $0x40] sm:$0xff] }
 0x120   :  { %2661 = vmatpush.msrb.mxu3 %v2626_v30 }
 0x121   :  { %2691 = vmatpush.msra.mxu0 %v2678_v43 }
 0x123   :  { %2692 = vmatpush.msra.mxu0 %v2677_v45 }
 0x124   :  { %v2415_v53 = vpop.f32.mrf.mxu2 }
 0x125   :  { %v2428_v54 = vpop.f32.mrf.mxu3  ;;  %2693 = vmatpush.msra.mxu0 %v2676_v46 }
 0x127   :  { %2694 = vmatpush.msra.mxu0 %v2675_v48 }
 0x129   :  { %2695 = vmatpush.msra.mxu0 %v2674_v50 }
 0x12b   :  { %2696 = vmatpush.msra.mxu0 %v2673_v51 }
 0x134   :  { %v2439_v55 = vpop.f32.mrf.mxu0 }
 0x135   :  { %v2440_v56 = vadd.f32 %v2439_v55, %v2427_v52  ;;  %v2452_v57 = vpop.f32.mrf.mxu1  ;;  %v2672_v55 = vld [vmem:[#allocation8 + $0x28] sm:$0xff] }
 0x136   :  { %2697 = vmatpush.msra.mxu0 %v2672_v55 }
 0x137   :  { %v2453_v58 = vadd.f32 %v2452_v57, %v2440_v56  ;;  %v2671_v57 = vld [vmem:[#allocation8 + $0x20] sm:$0xff] }
 0x138   :  { %2698 = vmatpush.msra.mxu0 %v2671_v57 }
 0x13c   :  { %v2465_v59 = vpop.f32.mrf.mxu2  ;;  %v2441_v62 = vpop.f32.mrf.mxu0 }
 0x13d   :  { %v2466_v60 = vadd.f32 %v2465_v59, %v2453_v58  ;;  %v2478_v61 = vpop.f32.mrf.mxu3  ;;  %v2454_v0 = vpop.f32.mrf.mxu1  ;;  %v2670_v58 = vld [vmem:[#allocation8 + $0x18] sm:$0xff] }
 0x13e   :  { %2699 = vmatpush.msra.mxu0 %v2670_v58 }
 0x13f   :  { %v2479_v63 = vadd.f32 %v2478_v61, %v2466_v60 }
 0x144   :  { %v2467_v1 = vpop.f32.mrf.mxu2 }
 0x145   :  { %v2480_v2 = vpop.f32.mrf.mxu3 }
 0x146   :  { %v2669_v2 = vld [vmem:[#allocation8 + $0x10] sm:$0xff] }
 0x147   :  { %2700 = vmatpush.msra.mxu0 %v2669_v2 }
 0x154   :  { %v2491_v3 = vpop.f32.mrf.mxu0 }
 0x155   :  { %v2504_v4 = vpop.f32.mrf.mxu1  ;;  %v2492_v29 = vadd.f32 %v2491_v3, %v2479_v63  ;;  %v2668_v3 = vld [vmem:[#allocation8 + $0x8] sm:$0xff] }
 0x156   :  { %2701 = vmatpush.msra.mxu0 %v2668_v3 }
 0x157   :  { %v2505_v34 = vadd.f32 %v2504_v4, %v2492_v29  ;;  %v2667_v4 = vld [vmem:[#allocation8] sm:$0xff] }
 0x158   :  { %2702 = vmatpush.msra.mxu0 %v2667_v4  ;;  %v4021_v29 = vld [vmem:[%s4275_s8] ss:$0 sm:$0xff] }
 0x15c   :  { %v2517_v5 = vpop.f32.mrf.mxu2  ;;  %v2493_v9 = vpop.f32.mrf.mxu0 }
 0x15d   :  { %v2530_v8 = vpop.f32.mrf.mxu3  ;;  %v2506_v10 = vpop.f32.mrf.mxu1  ;;  %v2518_v37 = vadd.f32 %v2517_v5, %v2505_v34  ;;  %v2723_v5 = vld [vmem:[#allocation10 + $0x78] sm:$0xff] }
 0x15e   :  { %2728 = vmatpush.msra.mxu1 %v2723_v5  ;;  %v2719_v9 = vld [vmem:[#allocation10 + $0x58] sm:$0xff]  ;;  %v2718_v10 = vld [vmem:[#allocation10 + $0x50] sm:$0xff] }
 0x15f   :  { %v2531_v42 = vadd.f32 %v2530_v8, %v2518_v37  ;;  %v2720_v8 = vld [vmem:[#allocation10 + $0x60] sm:$0xff] }
 0x160   :  { %2729 = vmatpush.msra.mxu1 %v2722_v6 }
 0x162   :  { %2730 = vmatpush.msra.mxu1 %v2721_v7 }
 0x164   :  { %v2519_v14 = vpop.f32.mrf.mxu2  ;;  %2731 = vmatpush.msra.mxu1 %v2720_v8 }
 0x165   :  { %v2532_v16 = vpop.f32.mrf.mxu3  ;;  %v2714_v14 = vld [vmem:[#allocation10 + $0x30] sm:$0xff] }
 0x166   :  { %2732 = vmatpush.msra.mxu1 %v2719_v9  ;;  %v2712_v16 = vld [vmem:[#allocation10 + $0x20] sm:$0xff] }
 0x168   :  { %2733 = vmatpush.msra.mxu1 %v2718_v10 }
 0x16a   :  { %2734 = vmatpush.msra.mxu1 %v2717_v11 }
 0x16c   :  { %2735 = vmatpush.msra.mxu1 %v2716_v12 }
 0x16e   :  { %2736 = vmatpush.msra.mxu1 %v2715_v13 }
 0x170   :  { %2737 = vmatpush.msra.mxu1 %v2714_v14 }
 0x172   :  { %2738 = vmatpush.msra.mxu1 %v2713_v15 }
 0x174   :  { %v2543_v23 = vpop.f32.mrf.mxu0  ;;  %2739 = vmatpush.msra.mxu1 %v2712_v16 }
 0x175   :  { %v2556_v25 = vpop.f32.mrf.mxu1  ;;  %v2544_v44 = vadd.f32 %v2543_v23, %v2531_v42  ;;  %v2709_v23 = vld [vmem:[#allocation10 + $0x8] sm:$0xff] }
 0x176   :  { %2740 = vmatpush.msra.mxu1 %v2711_v17 }
 0x177   :  { %v2557_v47 = vadd.f32 %v2556_v25, %v2544_v44  ;;  %v4020_v25 = vld [vmem:[%s4273_s6] ss:$0 sm:$0xff] }
 0x178   :  { %2741 = vmatpush.msra.mxu1 %v2710_v22 }
 0x17a   :  { %2742 = vmatpush.msra.mxu1 %v2709_v23 }
 0x17c   :  { %v2569_v28 = vpop.f32.mrf.mxu2  ;;  %v2545_v32 = vpop.f32.mrf.mxu0  ;;  %2743 = vmatpush.msra.mxu1 %v2708_v24 }
 0x17d   :  { %v2582_v31 = vpop.f32.mrf.mxu3  ;;  %v2558_v33 = vpop.f32.mrf.mxu1  ;;  %v2570_v49 = vadd.f32 %v2569_v28, %v2557_v47 }
 0x17f   :  { %v2583_v52 = vadd.f32 %v2582_v31, %v2570_v49 }
 0x184   :  { %v2571_v38 = vpop.f32.mrf.mxu2 }
 0x185   :  { %v2584_v40 = vpop.f32.mrf.mxu3 }
 0x194   :  { %v2595_v53 = vpop.f32.mrf.mxu0 }
 0x195   :  { %v2608_v54 = vpop.f32.mrf.mxu1  ;;  %v2596_v56 = vadd.f32 %v2595_v53, %v2583_v52 }
 0x197   :  { %v2609_v59 = vadd.f32 %v2608_v54, %v2596_v56 }
 0x19c   :  { %v2621_v60 = vpop.f32.mrf.mxu2  ;;  %v2597_v62 = vpop.f32.mrf.mxu0 }
 0x19d   :  { %v2622_v61 = vadd.f32 %v2621_v60, %v2609_v59  ;;  %v2610_v63 = vpop.f32.mrf.mxu1 }
 0x19f   :  { %v2625_v0 = vmax.f32 %v2622_v61, 0.0 }
 0x1a1   :  { %2662 = vmatmul.f32.vlgmr.msrb.gmra.mxu3 %v2625_v0 }
 0x1a4   :  { %v2623_v1 = vpop.f32.mrf.mxu2 }
 0x224   :  { %v2663_v19 = vpop.f32.mrf.mxu3 }
 0x225   :  { %v2664_v20 = vadd.f32 %v4019_v18, %v2663_v19 }
 0x227   :  { %v2666_v21 = vmax.f32 %v2664_v20, 0.0 }
 0x229   :  { %2703 = vmatmul.f32.vlgmr.msra.gmra.mxu0 %v2666_v21 }
 0x2a6   :  { %v2704_v26 = vpop.f32.mrf.mxu0 }
 0x2a7   :  { %v2705_v27 = vadd.f32 %v4020_v25, %v2704_v26 }
 0x2a9   :  { %v2707_v28 = vmax.f32 %v2705_v27, 0.0 }
 0x2ab   :  { %2744 = vmatmul.f32.vlgmr.msra.gmra.mxu1 %v2707_v28 }
 0x328   :  { %v2745_v30 = vpop.f32.mrf.mxu1 }
 0x329   :  { %v2746_v31 = vadd.f32 %v4021_v29, %v2745_v30 }
 0x32b   :  { %2748 = vst [vmem:[#allocation11] sm:$0xff] %v2746_v31 }
 0x32c   :  { %2759 = dma.vmem_to_hbm [thread:$0]  %s2755_s19, 128, %s2757_s22, [#allocation4]  }
 0x32d   :  { %4172 = dma.done.wait [#allocation4], 128  }
 0x32e   :  { %4173 = vsyncadd [#allocation4], 4294967168 }
 0x32f   :  { %2764 = vsyncpa [#allocation3], 1 }
 0x330   :  { %2765 = vsyncpa [#allocation6], 1 }
 0x331   :  { %2766 = vsyncpa [#allocation9], 1 }
 0x332   :  { %2767 = vsyncpa [#allocation4], 1 }

</bundles_post_ra>
